<compile_context>
chip_gen: v5e
topology: v5e:2x2
jax: 0.10.0
libtpu: 0.0.40
codegen_flags: <defaults>
</compile_context>

<pallas_src>
from functools import partial

import jax
import jax.numpy as jnp
import numpy as np
from jax.experimental import pallas as pl
from jax.experimental.pallas import tpu as pltpu


def _round_up(x, m):
    return ((x + m - 1) // m) * m


# ----------------------------- Pallas kernel -------------------------------

def _make_fused_kernel(num_conv_layers):
    """Fused DQN forward: refs = [x, (w, shift) * L, w_head, b_head, out]."""

    def kernel(*refs):
        x_ref = refs[0]
        o_ref = refs[-1]
        a = x_ref[...]                                    # bf16 activations
        for i in range(num_conv_layers):
            w_ref = refs[1 + 2 * i]                       # folded conv (+BN scale), bf16
            s_ref = refs[2 + 2 * i]                       # conv bias + BN shift, f32
            acc = jnp.dot(a, w_ref[...], preferred_element_type=jnp.float32)
            acc = jnp.maximum(acc + s_ref[...], 0.0)      # f32 epilogue (v5e-safe)
            a = acc.astype(jnp.bfloat16)                  # cast only at matmul input
        wh_ref = refs[1 + 2 * num_conv_layers]            # head (NHWC rows, padded cols)
        bh_ref = refs[2 + 2 * num_conv_layers]
        o_ref[...] = (jnp.dot(a, wh_ref[...], preferred_element_type=jnp.float32)
                      + bh_ref[...]).astype(o_ref.dtype)

    return kernel


@partial(jax.jit, static_argnames=("n_actions", "block_m"))
def dqn_forward(x_nchw, params, n_actions=2, block_m=256):
    n = x_nchw.shape[0]
    # NCHW flatten is a free reshape; channel ordering is folded into w1.
    x_flat = x_nchw.reshape(n, -1).astype(jnp.bfloat16)
    k_in = x_flat.shape[1]

    # 1-D batch grid: blocks of up to `block_m` rows, padded to 8 sublanes.
    bm = min(block_m, _round_up(n, 8))
    n_pad = _round_up(n, bm)
    if n_pad != n:
        x_flat = jnp.pad(x_flat, ((0, n_pad - n), (0, 0)))
    grid = (n_pad // bm,)

    conv_w, conv_s = params["conv_w"], params["conv_s"]
    wh, bh = params["wh"], params["bh"]

    operands = [x_flat]
    in_specs = [pl.BlockSpec((bm, k_in), lambda i: (i, 0))]
    for w, s in zip(conv_w, conv_s):
        operands += [w, s]
        # Weights/shifts: same block for every grid step -> VMEM-resident.
        in_specs += [pl.BlockSpec(w.shape, lambda i: (0, 0)),
                     pl.BlockSpec(s.shape, lambda i: (0, 0))]
    operands += [wh, bh]
    in_specs += [pl.BlockSpec(wh.shape, lambda i: (0, 0)),
                 pl.BlockSpec(bh.shape, lambda i: (0, 0))]

    n_out = wh.shape[1]                                   # lane-dense (128)
    flops = 2 * n_pad * (k_in * conv_w[0].shape[1]
                         + sum(w.shape[0] * w.shape[1] for w in conv_w[1:])
                         + wh.shape[0] * n_out)
    bytes_accessed = (x_flat.size * 2
                      + sum(w.size * 2 + s.size * 4 for w, s in zip(conv_w, conv_s))
                      + wh.size * 2 + bh.size * 4 + n_pad * n_out * 4)

    out = pl.pallas_call(
        _make_fused_kernel(len(conv_w)),
        out_shape=jax.ShapeDtypeStruct((n_pad, n_out), jnp.float32),
        grid=grid,
        in_specs=in_specs,
        out_specs=pl.BlockSpec((bm, n_out), lambda i: (i, 0)),
        compiler_params=pltpu.CompilerParams(
            dimension_semantics=("parallel",),            # v7x: shard batch over 2 TCs
            vmem_limit_bytes=32 * 1024 * 1024),
        cost_estimate=pl.CostEstimate(flops=flops, transcendentals=0,
                                      bytes_accessed=bytes_accessed),
    )(*operands)
    return out[:n, :n_actions]


# ------------------------- offline weight folding --------------------------

def _size_out(size, kernel, stride, padding):
    # mirrors ConvBlock.size_out
    return (size - kernel + 2 * padding) // stride + 1


def _tap_selector(in_size, out_size, kernel, stride, padding):
    # S[k][i, o] = 1 iff input index i feeds output index o through tap k,
    # i.e. i == stride*o + k - padding (out-of-range taps hit the zero pad).
    s = np.zeros((kernel, in_size, out_size), np.float32)
    for k in range(kernel):
        for o in range(out_size):
            i = stride * o + k - padding
            if 0 <= i < in_size:
                s[k, i, o] = 1.0
    return s


def _fold_conv(w_hwio, scale, shift, h, w, stride, padding, rows_are_nchw):
    """Fold conv + zero-pad + eval-BatchNorm affine into one dense matmul.

    Returns (dense, shift_row, oh, ow) with
      dense: (h*w*cin, oh*ow*cout) so flat_in @ dense == conv output flattened
             in (oh, ow, cout) NHWC order, with the BN scale pre-applied.
      shift_row: (1, oh*ow*cout) additive term (conv bias + BN shift).
    """
    kh, kw, cin, cout = w_hwio.shape
    oh = _size_out(h, kh, stride, padding)
    ow = _size_out(w, kw, stride, padding)
    sel_h = _tap_selector(h, oh, kh, stride, padding)
    sel_w = _tap_selector(w, ow, kw, stride, padding)
    w_scaled = w_hwio * scale[None, None, None, :]
    # t[h, w, ci, oh, ow, co] = sum_{kh,kw} sel_h[kh,h,oh]*sel_w[kw,w,ow]*w[kh,kw,ci,co]
    t = np.einsum("ahy,bwx,abic->hwiyxc", sel_h, sel_w, w_scaled)
    if rows_are_nchw:                       # first layer eats the NCHW input
        t = np.transpose(t, (2, 0, 1, 3, 4, 5))
    dense = t.reshape(h * w * cin, oh * ow * cout)
    shift_row = np.tile(shift, oh * ow)[None, :]
    return dense.astype(np.float32), shift_row.astype(np.float32), oh, ow


def init_params(key, h, w, conv_layer_settings, n_actions=2):
    """Mirrors DQN.__init__ shapes (dueling=False); folds conv/BN/layout offline."""
    # TODO(synk): dueling head (adv/val branches) not implemented; dueling=False only.
    # TODO(synk): training-mode BatchNorm (batch statistics) not implemented;
    #             eval-mode running stats are folded into the dense conv matrices.
    ref_convs, dense, shifts = [], [], []
    size_h, size_w = h, w
    rows_are_nchw = True
    for (cin, cout, k, stride) in conv_layer_settings:
        key, k1, k2 = jax.random.split(key, 3)
        fan_in = cin * k * k
        bound = 1.0 / float(np.sqrt(fan_in))
        w_conv = np.asarray(jax.random.uniform(k1, (k, k, cin, cout), jnp.float32,
                                               -bound, bound))   # (KH, KW, Cin, Cout)
        b_conv = np.asarray(jax.random.uniform(k2, (cout,), jnp.float32,
                                               -bound, bound))
        # BatchNorm2d(eval) with fresh parameters / running stats.
        gamma = np.ones((cout,), np.float32)
        beta = np.zeros((cout,), np.float32)
        mean = np.zeros((cout,), np.float32)
        var = np.ones((cout,), np.float32)
        eps = 1e-5
        scale = gamma / np.sqrt(var + eps)
        shift = (b_conv - mean) * scale + beta
        pad = k // 2
        d, s_row, size_h, size_w = _fold_conv(w_conv, scale, shift, size_h,
                                              size_w, stride, pad, rows_are_nchw)
        dense.append(d)
        shifts.append(s_row)
        ref_convs.append(dict(w=w_conv, b=b_conv, gamma=gamma, beta=beta,
                              mean=mean, var=var, eps=eps, stride=stride, pad=pad))
        rows_are_nchw = False               # later layers consume NHWC activations

    c_last = conv_layer_settings[-1][1]
    lin_in = size_h * size_w * c_last
    key, k1, k2 = jax.random.split(key, 3)
    bound = 1.0 / float(np.sqrt(lin_in))
    w_head = np.asarray(jax.random.uniform(k1, (lin_in, n_actions), jnp.float32,
                                           -bound, bound))       # NCHW-flatten rows
    b_head = np.asarray(jax.random.uniform(k2, (1, n_actions), jnp.float32,
                                           -bound, bound))
    # Permute head rows once so NHWC-ordered conv features feed it directly
    # (== PyTorch's x.view(N, -1) on an NCHW tensor); no runtime transpose.
    nchw_of_nhwc = np.transpose(np.arange(lin_in).reshape(c_last, size_h, size_w),
                                (1, 2, 0)).reshape(-1)
    w_head_nhwc = w_head[nchw_of_nhwc]

    # Pad head to a lane-dense 128 output columns (unmasked full-lane stores).
    n_out_pad = _round_up(max(n_actions, 128), 128)
    w_head_pad = np.zeros((lin_in, n_out_pad), np.float32)
    w_head_pad[:, :n_actions] = w_head_nhwc
    b_head_pad = np.zeros((1, n_out_pad), np.float32)
    b_head_pad[0, :n_actions] = b_head[0]

    # bf16 weights (DMA-bound kernel) + f32 additive terms (f32 epilogue).
    params = dict(conv_w=[jnp.asarray(d, dtype=jnp.bfloat16) for d in dense],
                  conv_s=[jnp.asarray(s) for s in shifts],
                  wh=jnp.asarray(w_head_pad, dtype=jnp.bfloat16),
                  bh=jnp.asarray(b_head_pad))
    ref = dict(convs=ref_convs, w_head=w_head, b_head=b_head)
    return params, ref


# --------------------------- pure-JAX reference -----------------------------

def reference_forward(x_nchw, ref):
    y = x_nchw.astype(jnp.float32)
    for p in ref["convs"]:
        y = jax.lax.conv_general_dilated(
            y, jnp.asarray(p["w"]),
            window_strides=(p["stride"], p["stride"]),
            padding=((p["pad"], p["pad"]), (p["pad"], p["pad"])),
            dimension_numbers=("NCHW", "HWIO", "NCHW"),
            precision=jax.lax.Precision.HIGHEST)
        y = y + jnp.asarray(p["b"])[None, :, None, None]
        inv = p["gamma"] / np.sqrt(p["var"] + p["eps"])
        y = ((y - jnp.asarray(p["mean"])[None, :, None, None])
             * jnp.asarray(inv)[None, :, None, None]
             + jnp.asarray(p["beta"])[None, :, None, None])
        y = jnp.maximum(y, 0.0)
    flat = y.reshape(y.shape[0], -1)                       # PyTorch NCHW flatten
    return (jnp.dot(flat, jnp.asarray(ref["w_head"]),
                    precision=jax.lax.Precision.HIGHEST)
            + jnp.asarray(ref["b_head"]))


if __name__ == "__main__":
    key = jax.random.PRNGKey(0)
    h = w = 16
    batch = 2
    n_actions = 2
    # conv_layer_settings: (input_channels, output_channels, kernel_size, stride)
    conv_layer_settings = [(4, 8, 3, 2), (8, 16, 3, 2)]

    key, kx, kp = jax.random.split(key, 3)
    x = jax.random.normal(kx, (batch, conv_layer_settings[0][0], h, w), jnp.float32)
    params, ref = init_params(kp, h, w, conv_layer_settings, n_actions=n_actions)

    out = jax.block_until_ready(dqn_forward(x, params, n_actions=n_actions))
    assert out.shape == (batch, n_actions), out.shape

    # Correctness check against a pure-JAX (f32) rendering of the PyTorch
    # forward.  Tolerance is sized for bf16 (~2^-8 rel.) weights/activations
    # through three f32-accumulated matmuls; observed error is ~1e-3.
    expected = jax.block_until_ready(reference_forward(x, ref))
    max_err = float(jnp.max(jnp.abs(out - expected)))
    assert max_err < 3e-2, f"mismatch vs reference: {max_err}"
    print("KERNEL_OK")
</pallas_src>

<mosaic_0001>
module attributes {stable_mosaic.version = 11 : i64} {
  func.func @kernel(%arg0: i32, %arg1: memref<8x1024xbf16, #tpu.memory_space<vmem>>, %arg2: memref<1024x512xbf16, #tpu.memory_space<vmem>>, %arg3: memref<1x512xf32, #tpu.memory_space<vmem>>, %arg4: memref<512x256xbf16, #tpu.memory_space<vmem>>, %arg5: memref<1x256xf32, #tpu.memory_space<vmem>>, %arg6: memref<256x128xbf16, #tpu.memory_space<vmem>>, %arg7: memref<1x128xf32, #tpu.memory_space<vmem>>, %arg8: memref<8x128xf32, #tpu.memory_space<vmem>>) attributes {dimension_semantics = [#tpu.dimension_semantics<parallel>], iteration_bounds = array<i64: 1>, scalar_prefetch = 0 : i64, scratch_operands = 0 : i64, tpu.core_type = #tpu.core_type<tc>, window_params = [{transform_indices = @transform_0, window_bounds = array<i64: 8, 1024>}, {pipeline_mode = #tpu.pipeline_mode<synchronous>, transform_indices = @transform_1, window_bounds = array<i64: 1024, 512>}, {pipeline_mode = #tpu.pipeline_mode<synchronous>, transform_indices = @transform_2, window_bounds = array<i64: 1, 512>}, {pipeline_mode = #tpu.pipeline_mode<synchronous>, transform_indices = @transform_3, window_bounds = array<i64: 512, 256>}, {pipeline_mode = #tpu.pipeline_mode<synchronous>, transform_indices = @transform_4, window_bounds = array<i64: 1, 256>}, {pipeline_mode = #tpu.pipeline_mode<synchronous>, transform_indices = @transform_5, window_bounds = array<i64: 256, 128>}, {pipeline_mode = #tpu.pipeline_mode<synchronous>, transform_indices = @transform_6, window_bounds = array<i64: 1, 128>}, {transform_indices = @transform_7, window_bounds = array<i64: 8, 128>}]} {
    %c0 = arith.constant 0 : index
    %c0_0 = arith.constant 0 : index
    %0 = vector.load %arg1[%c0, %c0_0] : memref<8x1024xbf16, #tpu.memory_space<vmem>>, vector<8x1024xbf16>
    %c0_1 = arith.constant 0 : index
    %c0_2 = arith.constant 0 : index
    %1 = vector.load %arg2[%c0_1, %c0_2] : memref<1024x512xbf16, #tpu.memory_space<vmem>>, vector<1024x512xbf16>
    %cst = arith.constant dense<0.000000e+00> : vector<8x512xf32>
    %2 = tpu.matmul %0, %1, %cst {dimension_numbers = #tpu.dot_dimension_numbers<[1], [0], [0], [1], [0, 0, 1, 1], [], []>} : vector<8x1024xbf16>, vector<1024x512xbf16>, vector<8x512xf32> -> vector<8x512xf32>
    %c0_3 = arith.constant 0 : index
    %c0_4 = arith.constant 0 : index
    %3 = vector.load %arg3[%c0_3, %c0_4] : memref<1x512xf32, #tpu.memory_space<vmem>>, vector<1x512xf32>
    %4 = vector.broadcast %3 : vector<1x512xf32> to vector<8x512xf32>
    %5 = arith.addf %2, %4 : vector<8x512xf32>
    %cst_5 = arith.constant 0.000000e+00 : f32
    %6 = vector.broadcast %cst_5 : f32 to vector<8x512xf32>
    %7 = arith.maximumf %5, %6 : vector<8x512xf32>
    %8 = arith.truncf %7 : vector<8x512xf32> to vector<8x512xbf16>
    %c0_6 = arith.constant 0 : index
    %c0_7 = arith.constant 0 : index
    %9 = vector.load %arg4[%c0_6, %c0_7] : memref<512x256xbf16, #tpu.memory_space<vmem>>, vector<512x256xbf16>
    %cst_8 = arith.constant dense<0.000000e+00> : vector<8x256xf32>
    %10 = tpu.matmul %8, %9, %cst_8 {dimension_numbers = #tpu.dot_dimension_numbers<[1], [0], [0], [1], [0, 0, 1, 1], [], []>} : vector<8x512xbf16>, vector<512x256xbf16>, vector<8x256xf32> -> vector<8x256xf32>
    %c0_9 = arith.constant 0 : index
    %c0_10 = arith.constant 0 : index
    %11 = vector.load %arg5[%c0_9, %c0_10] : memref<1x256xf32, #tpu.memory_space<vmem>>, vector<1x256xf32>
    %12 = vector.broadcast %11 : vector<1x256xf32> to vector<8x256xf32>
    %13 = arith.addf %10, %12 : vector<8x256xf32>
    %cst_11 = arith.constant 0.000000e+00 : f32
    %14 = vector.broadcast %cst_11 : f32 to vector<8x256xf32>
    %15 = arith.maximumf %13, %14 : vector<8x256xf32>
    %16 = arith.truncf %15 : vector<8x256xf32> to vector<8x256xbf16>
    %c0_12 = arith.constant 0 : index
    %c0_13 = arith.constant 0 : index
    %17 = vector.load %arg6[%c0_12, %c0_13] : memref<256x128xbf16, #tpu.memory_space<vmem>>, vector<256x128xbf16>
    %cst_14 = arith.constant dense<0.000000e+00> : vector<8x128xf32>
    %18 = tpu.matmul %16, %17, %cst_14 {dimension_numbers = #tpu.dot_dimension_numbers<[1], [0], [0], [1], [0, 0, 1, 1], [], []>} : vector<8x256xbf16>, vector<256x128xbf16>, vector<8x128xf32> -> vector<8x128xf32>
    %c0_15 = arith.constant 0 : index
    %c0_16 = arith.constant 0 : index
    %19 = vector.load %arg7[%c0_15, %c0_16] : memref<1x128xf32, #tpu.memory_space<vmem>>, vector<1x128xf32>
    %20 = vector.broadcast %19 : vector<1x128xf32> to vector<8x128xf32>
    %21 = arith.addf %18, %20 : vector<8x128xf32>
    %c0_17 = arith.constant 0 : index
    %c0_18 = arith.constant 0 : index
    %22 = vector.load %arg8[%c0_17, %c0_18] : memref<8x128xf32, #tpu.memory_space<vmem>>, vector<8x128xf32>
    tpu.vector_store %arg8[%c0_17, %c0_18], %21 {strides = array<i32>} : memref<8x128xf32, #tpu.memory_space<vmem>>, vector<8x128xf32>,
    return
  }
  func.func @transform_0(%arg0: i32) -> (i32, i32) {
    %c0_i32 = arith.constant 0 : i32
    %c0_i32_0 = arith.constant 0 : i32
    return %arg0, %c0_i32 : i32, i32
  }
  func.func @transform_1(%arg0: i32) -> (i32, i32) {
    %c0_i32 = arith.constant 0 : i32
    %c0_i32_0 = arith.constant 0 : i32
    %c0_i32_1 = arith.constant 0 : i32
    return %c0_i32, %c0_i32_0 : i32, i32
  }
  func.func @transform_2(%arg0: i32) -> (i32, i32) {
    %c0_i32 = arith.constant 0 : i32
    %c0_i32_0 = arith.constant 0 : i32
    %c0_i32_1 = arith.constant 0 : i32
    return %c0_i32, %c0_i32_0 : i32, i32
  }
  func.func @transform_3(%arg0: i32) -> (i32, i32) {
    %c0_i32 = arith.constant 0 : i32
    %c0_i32_0 = arith.constant 0 : i32
    %c0_i32_1 = arith.constant 0 : i32
    return %c0_i32, %c0_i32_0 : i32, i32
  }
  func.func @transform_4(%arg0: i32) -> (i32, i32) {
    %c0_i32 = arith.constant 0 : i32
    %c0_i32_0 = arith.constant 0 : i32
    %c0_i32_1 = arith.constant 0 : i32
    return %c0_i32, %c0_i32_0 : i32, i32
  }
  func.func @transform_5(%arg0: i32) -> (i32, i32) {
    %c0_i32 = arith.constant 0 : i32
    %c0_i32_0 = arith.constant 0 : i32
    %c0_i32_1 = arith.constant 0 : i32
    return %c0_i32, %c0_i32_0 : i32, i32
  }
  func.func @transform_6(%arg0: i32) -> (i32, i32) {
    %c0_i32 = arith.constant 0 : i32
    %c0_i32_0 = arith.constant 0 : i32
    %c0_i32_1 = arith.constant 0 : i32
    return %c0_i32, %c0_i32_0 : i32, i32
  }
  func.func @transform_7(%arg0: i32) -> (i32, i32) {
    %c0_i32 = arith.constant 0 : i32
    %c0_i32_0 = arith.constant 0 : i32
    return %arg0, %c0_i32 : i32, i32
  }
}

</mosaic_0001>

<bundles_post_ra>
// kernel: dqn_forward.1
= control target key start
LH: loop header
LB: loop body
LE: loop exit
PB: predicated region body
PF: predicated region fallthrough
CT: control target
= control target key end

     0   :  { %12 = vsyncpa [#allocation3], 0  ;;  %s4675_s0 = inlined_call_operand.vmem [shape: bf16[8,1024], index: 0, kind: input, shape index: {}]   ;;  %s4676_s1 = inlined_call_operand.hbm [shape: bf16[1024,512], index: 1, kind: input, shape index: {}]   ;;  %s4677_s2 = inlined_call_operand.vmem [shape: f32[1,512], index: 2, kind: input, shape index: {}]   ;;  %s4678_s3 = inlined_call_operand.hbm [shape: bf16[512,256], index: 3, kind: input, shape index: {}]   ;;  %s4679_s4 = inlined_call_operand.vmem [shape: f32[1,256], index: 4, kind: input, shape index: {}]   ;;  %s4680_s5 = inlined_call_operand.vmem [shape: bf16[256,128], index: 5, kind: input, shape index: {}]   ;;  %s4681_s6 = inlined_call_operand.vmem [shape: f32[1,128], index: 6, kind: input, shape index: {}]   ;;  %s4682_s7 = inlined_call_operand.vmem [shape: f32[8,128], index: 7, kind: output, shape index: {}]  }
   0x1   :  { %s20_s26 = sshll.u32 %s4676_s1, 4  ;;  %s21_s26 = int_to_ptr.hbm [resolvable:$true] %s20_s26 }
   0x2   :  { %13 = vsyncpa [#allocation5], 0  ;;  %s4463_s27 = smov [#allocation2]   ;;  %s35_s8 = sshll.u32 %s4678_s3, 4  ;;  %s36_s8 = int_to_ptr.hbm [resolvable:$true] %s35_s8 }
   0x3   :  { %s22_s28 = sshll.u32 %s4463_s27, 4  ;;  %s4464_s9 = smov 256   ;;  %s23_s28 = int_to_ptr.vmem [resolvable:$true] %s22_s28 }
   0x4   :  { %s4465_s10 = smov 16   ;;  %s4466_s11 = smov [#allocation4]  }
   0x5   :  { %28 = dma.hbm_to_vmem [thread:$0]  %s21_s26, 32768, %s23_s28, [#allocation3], %s4464_s9, %s4464_s9, %s4465_s10  }
   0x6   :  { %s37_s12 = sshll.u32 %s4466_s11, 4  ;;  %s4467_s13 = smov 128   ;;  %s38_s12 = int_to_ptr.vmem [resolvable:$true] %s37_s12 }
   0x7   :  { %s4468_s14 = smov 8  }
   0x8   :  { %43 = dma.hbm_to_vmem [thread:$0]  %s36_s8, 8192, %s38_s12, [#allocation5], %s4467_s13, %s4467_s13, %s4468_s14  }
   0x9   :  { %4459 = dma.done.wait [#allocation3], 32768  }
   0xa   :  { %4460 = vsyncadd [#allocation3], 4294934528 }
   0xb   :  { %4461 = dma.done.wait [#allocation5], 8192  }
   0xc   :  { %4462 = vsyncadd [#allocation5], 4294959104  ;;  %v2837_v0 = vld [vmem:[#allocation2 + $0xe0] sm:$0xf]  ;;  %v4097_v1 = vld [vmem:[#allocation2 + $0xec] sm:$0xf0] }
   0xd   :  { %v2965_v2 = vld [vmem:[#allocation2 + $0x1e0] sm:$0xf]  ;;  %v2838_v3 = vor.u32 %v4097_v1, %v2837_v0  ;;  %v4129_v4 = vld [vmem:[#allocation2 + $0x1ec] sm:$0xf0] }
   0xe   :  { %v3093_v5 = vld [vmem:[#allocation2 + $0x2e0] sm:$0xf]  ;;  %v4161_v6 = vld [vmem:[#allocation2 + $0x2ec] sm:$0xf0]  ;;  %v2966_v7 = vor.u32 %v4129_v4, %v2965_v2 }
   0xf   :  { %v3094_v8 = vor.u32 %v4161_v6, %v3093_v5  ;;  %v3221_v9 = vld [vmem:[#allocation2 + $0x3e0] sm:$0xf]  ;;  %v4193_v10 = vld [vmem:[#allocation2 + $0x3ec] sm:$0xf0]  ;;  %1636 = vmatpush.bf16.msra.mxu0 %v2838_v3 }
  0x10   :  { %v2821_v11 = vld [vmem:[#allocation2 + $0xc0] sm:$0xf]  ;;  %v3222_v12 = vor.u32 %v4193_v10, %v3221_v9  ;;  %v4093_v13 = vld [vmem:[#allocation2 + $0xcc] sm:$0xf0]  ;;  %1649 = vmatpush.bf16.msra.mxu1 %v2966_v7 }
  0x11   :  { %v2949_v14 = vld [vmem:[#allocation2 + $0x1c0] sm:$0xf]  ;;  %v4125_v15 = vld [vmem:[#allocation2 + $0x1cc] sm:$0xf0]  ;;  %1662 = vmatpush.bf16.msra.mxu2 %v3094_v8  ;;  %v2822_v16 = vor.u32 %v4093_v13, %v2821_v11 }
  0x12   :  { %v2950_v17 = vor.u32 %v4125_v15, %v2949_v14  ;;  %v3077_v18 = vld [vmem:[#allocation2 + $0x2c0] sm:$0xf]  ;;  %v4157_v19 = vld [vmem:[#allocation2 + $0x2cc] sm:$0xf0]  ;;  %1675 = vmatpush.bf16.msra.mxu3 %v3222_v12 }
  0x13   :  { %v3205_v20 = vld [vmem:[#allocation2 + $0x3c0] sm:$0xf]  ;;  %v3078_v21 = vor.u32 %v4157_v19, %v3077_v18  ;;  %v4189_v22 = vld [vmem:[#allocation2 + $0x3cc] sm:$0xf0]  ;;  %1637 = vmatpush.bf16.msra.mxu0 %v2822_v16 }
  0x14   :  { %v2805_v23 = vld [vmem:[#allocation2 + $0xa0] sm:$0xf]  ;;  %v4089_v24 = vld [vmem:[#allocation2 + $0xac] sm:$0xf0]  ;;  %v3206_v25 = vor.u32 %v4189_v22, %v3205_v20  ;;  %1650 = vmatpush.bf16.msra.mxu1 %v2950_v17 }
  0x15   :  { %v2933_v26 = vld [vmem:[#allocation2 + $0x1a0] sm:$0xf]  ;;  %v4121_v27 = vld [vmem:[#allocation2 + $0x1ac] sm:$0xf0]  ;;  %v2806_v29 = vor.u32 %v4089_v24, %v2805_v23  ;;  %1663 = vmatpush.bf16.msra.mxu2 %v3078_v21 }
  0x16   :  { %v3061_v28 = vld [vmem:[#allocation2 + $0x2a0] sm:$0xf]  ;;  %v4153_v30 = vld [vmem:[#allocation2 + $0x2ac] sm:$0xf0]  ;;  %v2934_v33 = vor.u32 %v4121_v27, %v2933_v26  ;;  %1676 = vmatpush.bf16.msra.mxu3 %v3206_v25 }
  0x17   :  { %v3189_v31 = vld [vmem:[#allocation2 + $0x3a0] sm:$0xf]  ;;  %v4185_v32 = vld [vmem:[#allocation2 + $0x3ac] sm:$0xf0]  ;;  %v3062_v34 = vor.u32 %v4153_v30, %v3061_v28  ;;  %1638 = vmatpush.bf16.msra.mxu0 %v2806_v29 }
  0x18   :  { %v2789_v35 = vld [vmem:[#allocation2 + $0x80] sm:$0xf]  ;;  %v4085_v36 = vld [vmem:[#allocation2 + $0x8c] sm:$0xf0]  ;;  %v3190_v38 = vor.u32 %v4185_v32, %v3189_v31  ;;  %1651 = vmatpush.bf16.msra.mxu1 %v2934_v33 }
  0x19   :  { %v2917_v37 = vld [vmem:[#allocation2 + $0x180] sm:$0xf]  ;;  %v4117_v39 = vld [vmem:[#allocation2 + $0x18c] sm:$0xf0]  ;;  %v2790_v44 = vor.u32 %v4085_v36, %v2789_v35  ;;  %1664 = vmatpush.bf16.msra.mxu2 %v3062_v34 }
  0x1a   :  { %v3045_v40 = vld [vmem:[#allocation2 + $0x280] sm:$0xf]  ;;  %v4149_v41 = vld [vmem:[#allocation2 + $0x28c] sm:$0xf0]  ;;  %v2918_v45 = vor.u32 %v4117_v39, %v2917_v37  ;;  %1677 = vmatpush.bf16.msra.mxu3 %v3190_v38 }
  0x1b   :  { %v3173_v42 = vld [vmem:[#allocation2 + $0x380] sm:$0xf]  ;;  %v4181_v43 = vld [vmem:[#allocation2 + $0x38c] sm:$0xf0]  ;;  %v3046_v46 = vor.u32 %v4149_v41, %v3045_v40  ;;  %1639 = vmatpush.bf16.msra.mxu0 %v2790_v44 }
  0x1c   :  { %v2773_v47 = vld [vmem:[#allocation2 + $0x60] sm:$0xf]  ;;  %v4081_v48 = vld [vmem:[#allocation2 + $0x6c] sm:$0xf0]  ;;  %v3174_v50 = vor.u32 %v4181_v43, %v3173_v42  ;;  %1652 = vmatpush.bf16.msra.mxu1 %v2918_v45 }
  0x1d   :  { %v2901_v49 = vld [vmem:[#allocation2 + $0x160] sm:$0xf]  ;;  %v4113_v51 = vld [vmem:[#allocation2 + $0x16c] sm:$0xf0]  ;;  %v2774_v56 = vor.u32 %v4081_v48, %v2773_v47  ;;  %1665 = vmatpush.bf16.msra.mxu2 %v3046_v46 }
  0x1e   :  { %v3029_v52 = vld [vmem:[#allocation2 + $0x260] sm:$0xf]  ;;  %v4145_v53 = vld [vmem:[#allocation2 + $0x26c] sm:$0xf0]  ;;  %v2902_v57 = vor.u32 %v4113_v51, %v2901_v49  ;;  %1678 = vmatpush.bf16.msra.mxu3 %v3174_v50 }
  0x1f   :  { %v3157_v54 = vld [vmem:[#allocation2 + $0x360] sm:$0xf]  ;;  %v4177_v55 = vld [vmem:[#allocation2 + $0x36c] sm:$0xf0]  ;;  %v3030_v58 = vor.u32 %v4145_v53, %v3029_v52  ;;  %1640 = vmatpush.bf16.msra.mxu0 %v2774_v56 }
  0x20   :  { %v2757_v59 = vld [vmem:[#allocation2 + $0x40] sm:$0xf]  ;;  %v4077_v60 = vld [vmem:[#allocation2 + $0x4c] sm:$0xf0]  ;;  %v3158_v62 = vor.u32 %v4177_v55, %v3157_v54  ;;  %1653 = vmatpush.bf16.msra.mxu1 %v2902_v57 }
  0x21   :  { %v2885_v61 = vld [vmem:[#allocation2 + $0x140] sm:$0xf]  ;;  %v4109_v63 = vld [vmem:[#allocation2 + $0x14c] sm:$0xf0]  ;;  %v2758_v4 = vor.u32 %v4077_v60, %v2757_v59  ;;  %1666 = vmatpush.bf16.msra.mxu2 %v3030_v58 }
  0x22   :  { %v3013_v0 = vld [vmem:[#allocation2 + $0x240] sm:$0xf]  ;;  %v4141_v1 = vld [vmem:[#allocation2 + $0x24c] sm:$0xf0]  ;;  %v2886_v5 = vor.u32 %v4109_v63, %v2885_v61  ;;  %1679 = vmatpush.bf16.msra.mxu3 %v3158_v62 }
  0x23   :  { %v3141_v2 = vld [vmem:[#allocation2 + $0x340] sm:$0xf]  ;;  %v4173_v3 = vld [vmem:[#allocation2 + $0x34c] sm:$0xf0]  ;;  %v3014_v6 = vor.u32 %v4141_v1, %v3013_v0  ;;  %1641 = vmatpush.bf16.msra.mxu0 %v2758_v4 }
  0x24   :  { %v2741_v7 = vld [vmem:[#allocation2 + $0x20] sm:$0xf]  ;;  %v4073_v8 = vld [vmem:[#allocation2 + $0x2c] sm:$0xf0]  ;;  %v3142_v10 = vor.u32 %v4173_v3, %v3141_v2  ;;  %1654 = vmatpush.bf16.msra.mxu1 %v2886_v5  ;;  %v59_v2 = vld [vmem:[%s4675_s0 + $0x8] sm:$0xff] }
  0x25   :  { %v2869_v9 = vld [vmem:[#allocation2 + $0x120] sm:$0xf]  ;;  %v4105_v11 = vld [vmem:[#allocation2 + $0x12c] sm:$0xf0]  ;;  %v2742_v16 = vor.u32 %v4073_v8, %v2741_v7  ;;  %1667 = vmatpush.bf16.msra.mxu2 %v3014_v6  ;;  %v334_v8 = vunpack.c.l.b16 %v59_v2 }
  0x26   :  { %v2997_v12 = vld [vmem:[#allocation2 + $0x220] sm:$0xf]  ;;  %v4137_v13 = vld [vmem:[#allocation2 + $0x22c] sm:$0xf0]  ;;  %v2870_v19 = vor.u32 %v4105_v11, %v2869_v9  ;;  %1680 = vmatpush.bf16.msra.mxu3 %v3142_v10  ;;  %v335_v10 = vunpack.c.h.b16 %v59_v2 }
  0x27   :  { %v3125_v14 = vld [vmem:[#allocation2 + $0x320] sm:$0xf]  ;;  %v4169_v15 = vld [vmem:[#allocation2 + $0x32c] sm:$0xf0]  ;;  %v2998_v20 = vor.u32 %v4137_v13, %v2997_v12  ;;  %1642 = vmatpush.bf16.msra.mxu0 %v2742_v16 }
  0x28   :  { %v2725_v17 = vld [vmem:[#allocation2] sm:$0xf]  ;;  %v4069_v18 = vld [vmem:[#allocation2 + $0xc] sm:$0xf0]  ;;  %v3126_v24 = vor.u32 %v4169_v15, %v3125_v14  ;;  %1655 = vmatpush.bf16.msra.mxu1 %v2870_v19 }
  0x29   :  { %v2853_v21 = vld [vmem:[#allocation2 + $0x100] sm:$0xf]  ;;  %v4101_v22 = vld [vmem:[#allocation2 + $0x10c] sm:$0xf0]  ;;  %v2726_v31 = vor.u32 %v4069_v18, %v2725_v17  ;;  %1668 = vmatpush.bf16.msra.mxu2 %v2998_v20  ;;  %v4521_v18 = vpack.c.b16 %v334_v8, %v334_v8  ;;  %v4525_v20 = vpack.c.b16 %v335_v10, %v335_v10  ;;  %v4095_v8 = vld [vmem:[#allocation2 + $0xe4] sm:$0xf] }
  0x2a   :  { %v2981_v23 = vld [vmem:[#allocation2 + $0x200] sm:$0xf]  ;;  %v4133_v25 = vld [vmem:[#allocation2 + $0x20c] sm:$0xf0]  ;;  %v2854_v35 = vor.u32 %v4101_v22, %v2853_v21  ;;  %1681 = vmatpush.bf16.msra.mxu3 %v3126_v24  ;;  %v4127_v10 = vld [vmem:[#allocation2 + $0x1e4] sm:$0xf] }
  0x2b   :  { %v3109_v26 = vld [vmem:[#allocation2 + $0x300] sm:$0xf]  ;;  %v4165_v27 = vld [vmem:[#allocation2 + $0x30c] sm:$0xf0]  ;;  %v2982_v36 = vor.u32 %v4133_v25, %v2981_v23  ;;  %1643 = vmatpush.bf16.msra.mxu0 %v2726_v31 }
  0x2c   :  { %v3349_v28 = vld [vmem:[#allocation2 + $0x4e0] sm:$0xf]  ;;  %v4225_v29 = vld [vmem:[#allocation2 + $0x4ec] sm:$0xf0]  ;;  %v3110_v39 = vor.u32 %v4165_v27, %v3109_v26  ;;  %1656 = vmatpush.bf16.msra.mxu1 %v2854_v35 }
  0x2d   :  { %v3477_v30 = vld [vmem:[#allocation2 + $0x5e0] sm:$0xf]  ;;  %v4257_v32 = vld [vmem:[#allocation2 + $0x5ec] sm:$0xf0]  ;;  %v3350_v40 = vor.u32 %v4225_v29, %v3349_v28  ;;  %1669 = vmatpush.bf16.msra.mxu2 %v2982_v36 }
  0x2e   :  { %v3605_v33 = vld [vmem:[#allocation2 + $0x6e0] sm:$0xf]  ;;  %v4289_v34 = vld [vmem:[#allocation2 + $0x6ec] sm:$0xf0]  ;;  %v3478_v41 = vor.u32 %v4257_v32, %v3477_v30  ;;  %1682 = vmatpush.bf16.msra.mxu3 %v3110_v39 }
  0x2f   :  { %v3733_v37 = vld [vmem:[#allocation2 + $0x7e0] sm:$0xf]  ;;  %v4321_v38 = vld [vmem:[#allocation2 + $0x7ec] sm:$0xf0]  ;;  %v3606_v42 = vor.u32 %v4289_v34, %v3605_v33  ;;  %1688 = vmatpush.bf16.msrb.mxu0 %v3350_v40 }
  0x30   :  { %v3333_v43 = vld [vmem:[#allocation2 + $0x4c0] sm:$0xf]  ;;  %v4221_v44 = vld [vmem:[#allocation2 + $0x4cc] sm:$0xf0]  ;;  %v3734_v46 = vor.u32 %v4321_v38, %v3733_v37  ;;  %1701 = vmatpush.bf16.msrb.mxu1 %v3478_v41  ;;  %1670 = vmatmul.bf16.vlgmr.msra.gmra.mxu2 %v4521_v18 }
  0x31   :  { %v3461_v45 = vld [vmem:[#allocation2 + $0x5c0] sm:$0xf]  ;;  %v4253_v47 = vld [vmem:[#allocation2 + $0x5cc] sm:$0xf0]  ;;  %v3334_v52 = vor.u32 %v4221_v44, %v3333_v43  ;;  %1714 = vmatpush.bf16.msrb.mxu2 %v3606_v42  ;;  %1683 = vmatmul.bf16.vlgmr.msra.gmra.mxu3 %v4525_v20 }
  0x32   :  { %v3589_v48 = vld [vmem:[#allocation2 + $0x6c0] sm:$0xf]  ;;  %v4285_v49 = vld [vmem:[#allocation2 + $0x6cc] sm:$0xf0]  ;;  %v3462_v54 = vor.u32 %v4253_v47, %v3461_v45  ;;  %1727 = vmatpush.bf16.msrb.mxu3 %v3734_v46 }
  0x33   :  { %v3717_v50 = vld [vmem:[#allocation2 + $0x7c0] sm:$0xf]  ;;  %v4317_v51 = vld [vmem:[#allocation2 + $0x7cc] sm:$0xf0]  ;;  %v3590_v55 = vor.u32 %v4285_v49, %v3589_v48  ;;  %1689 = vmatpush.bf16.msrb.mxu0 %v3334_v52 }
  0x34   :  { %v3317_v53 = vld [vmem:[#allocation2 + $0x4a0] sm:$0xf]  ;;  %v4217_v56 = vld [vmem:[#allocation2 + $0x4ac] sm:$0xf0]  ;;  %v3718_v59 = vor.u32 %v4317_v51, %v3717_v50  ;;  %1702 = vmatpush.bf16.msrb.mxu1 %v3462_v54 }
  0x35   :  { %v3445_v57 = vld [vmem:[#allocation2 + $0x5a0] sm:$0xf]  ;;  %v4249_v58 = vld [vmem:[#allocation2 + $0x5ac] sm:$0xf0]  ;;  %v3318_v0 = vor.u32 %v4217_v56, %v3317_v53  ;;  %1715 = vmatpush.bf16.msrb.mxu2 %v3590_v55 }
  0x36   :  { %v3573_v60 = vld [vmem:[#allocation2 + $0x6a0] sm:$0xf]  ;;  %v4281_v61 = vld [vmem:[#allocation2 + $0x6ac] sm:$0xf0]  ;;  %v3446_v1 = vor.u32 %v4249_v58, %v3445_v57  ;;  %1728 = vmatpush.bf16.msrb.mxu3 %v3718_v59 }
  0x37   :  { %v3701_v62 = vld [vmem:[#allocation2 + $0x7a0] sm:$0xf]  ;;  %v4313_v63 = vld [vmem:[#allocation2 + $0x7ac] sm:$0xf0]  ;;  %v3574_v4 = vor.u32 %v4281_v61, %v3573_v60  ;;  %1690 = vmatpush.bf16.msrb.mxu0 %v3318_v0 }
  0x38   :  { %v58_v3 = vld [vmem:[%s4675_s0] sm:$0xff]  ;;  %v4213_v6 = vld [vmem:[#allocation2 + $0x48c] sm:$0xf0]  ;;  %v3702_v11 = vor.u32 %v4313_v63, %v3701_v62  ;;  %1703 = vmatpush.bf16.msrb.mxu1 %v3446_v1 }
  0x39   :  { %v3301_v5 = vld [vmem:[#allocation2 + $0x480] sm:$0xf]  ;;  %v332_v9 = vunpack.c.l.b16 %v58_v3  ;;  %v4245_v12 = vld [vmem:[#allocation2 + $0x58c] sm:$0xf0]  ;;  %v333_v15 = vunpack.c.h.b16 %v58_v3  ;;  %1716 = vmatpush.bf16.msrb.mxu2 %v3574_v4  ;;  %v61_v3 = vld [vmem:[%s4675_s0 + $0x18] sm:$0xff] }
  0x3a   :  { %v3429_v7 = vld [vmem:[#allocation2 + $0x580] sm:$0xf]  ;;  %v4277_v14 = vld [vmem:[#allocation2 + $0x68c] sm:$0xf0]  ;;  %v3302_v21 = vor.u32 %v4213_v6, %v3301_v5  ;;  %1729 = vmatpush.bf16.msrb.mxu3 %v3702_v11 }
  0x3b   :  { %v3557_v13 = vld [vmem:[#allocation2 + $0x680] sm:$0xf]  ;;  %v4309_v17 = vld [vmem:[#allocation2 + $0x78c] sm:$0xf0]  ;;  %v4523_v19 = vpack.c.b16 %v332_v9, %v332_v9  ;;  %v4527_v22 = vpack.c.b16 %v333_v15, %v333_v15  ;;  %v3430_v23 = vor.u32 %v4245_v12, %v3429_v7  ;;  %v2839_v9 = vld [vmem:[#allocation2 + $0xf0] sm:$0xf0]  ;;  %v338_v15 = vunpack.c.l.b16 %v61_v3 }
  0x3c   :  { %v3685_v16 = vld [vmem:[#allocation2 + $0x780] sm:$0xf]  ;;  %v3558_v24 = vor.u32 %v4277_v14, %v3557_v13  ;;  %v4209_v26 = vld [vmem:[#allocation2 + $0x46c] sm:$0xf0]  ;;  %1691 = vmatpush.bf16.msrb.mxu0 %v3302_v21  ;;  %v2967_v12 = vld [vmem:[#allocation2 + $0x1f0] sm:$0xf0] }
  0x3d   :  { %v3285_v25 = vld [vmem:[#allocation2 + $0x460] sm:$0xf]  ;;  %v3686_v28 = vor.u32 %v4309_v17, %v3685_v16  ;;  %v4241_v29 = vld [vmem:[#allocation2 + $0x56c] sm:$0xf0]  ;;  %1644 = vmatmul.bf16.vlgmr.msra.gmra.mxu0 %v4523_v19  ;;  %1657 = vmatmul.bf16.vlgmr.msra.gmra.mxu1 %v4527_v22  ;;  %v4159_v13 = vld [vmem:[#allocation2 + $0x2e4] sm:$0xf] }
  0x3e   :  { %v3413_v27 = vld [vmem:[#allocation2 + $0x560] sm:$0xf]  ;;  %v4273_v31 = vld [vmem:[#allocation2 + $0x66c] sm:$0xf0]  ;;  %v3286_v34 = vor.u32 %v4209_v26, %v3285_v25  ;;  %1704 = vmatpush.bf16.msrb.mxu1 %v3430_v23  ;;  %1717 = vmatpush.bf16.msrb.mxu2 %v3558_v24  ;;  %v3095_v14 = vld [vmem:[#allocation2 + $0x2f0] sm:$0xf0]  ;;  %v339_v25 = vunpack.c.h.b16 %v61_v3 }
  0x3f   :  { %v3541_v30 = vld [vmem:[#allocation2 + $0x660] sm:$0xf]  ;;  %v4305_v33 = vld [vmem:[#allocation2 + $0x76c] sm:$0xf0]  ;;  %v3414_v35 = vor.u32 %v4241_v29, %v3413_v27  ;;  %1730 = vmatpush.bf16.msrb.mxu3 %v3686_v28  ;;  %v4191_v21 = vld [vmem:[#allocation2 + $0x3e4] sm:$0xf]  ;;  %v2842_v27 = vor.u32 %v4095_v8, %v2839_v9  ;;  %v2970_v29 = vor.u32 %v4127_v10, %v2967_v12 }
  0x40   :  { %v3669_v32 = vld [vmem:[#allocation2 + $0x760] sm:$0xf]  ;;  %v3542_v36 = vor.u32 %v4273_v31, %v3541_v30  ;;  %v4205_v38 = vld [vmem:[#allocation2 + $0x44c] sm:$0xf0]  ;;  %1692 = vmatpush.bf16.msrb.mxu0 %v3286_v34  ;;  %v3223_v23 = vld [vmem:[#allocation2 + $0x3f0] sm:$0xf0]  ;;  %v3098_v30 = vor.u32 %v4159_v13, %v3095_v14 }
  0x41   :  { %v3269_v37 = vld [vmem:[#allocation2 + $0x440] sm:$0xf]  ;;  %v3670_v40 = vor.u32 %v4305_v33, %v3669_v32  ;;  %v4237_v41 = vld [vmem:[#allocation2 + $0x54c] sm:$0xf0]  ;;  %v4091_v31 = vld [vmem:[#allocation2 + $0xc4] sm:$0xf]  ;;  %v3226_v34 = vor.u32 %v4191_v21, %v3223_v23 }
  0x42   :  { %v3397_v39 = vld [vmem:[#allocation2 + $0x540] sm:$0xf]  ;;  %v4269_v43 = vld [vmem:[#allocation2 + $0x64c] sm:$0xf0]  ;;  %v3270_v46 = vor.u32 %v4205_v38, %v3269_v37  ;;  %1705 = vmatpush.bf16.msrb.mxu1 %v3414_v35  ;;  %1718 = vmatpush.bf16.msrb.mxu2 %v3542_v36  ;;  %v2823_v32 = vld [vmem:[#allocation2 + $0xd0] sm:$0xf0]  ;;  %v4539_v38 = vpack.c.b16 %v338_v15, %v338_v15 }
  0x43   :  { %v3525_v42 = vld [vmem:[#allocation2 + $0x640] sm:$0xf]  ;;  %v4301_v45 = vld [vmem:[#allocation2 + $0x74c] sm:$0xf0]  ;;  %v3398_v47 = vor.u32 %v4237_v41, %v3397_v39  ;;  %1731 = vmatpush.bf16.msrb.mxu3 %v3670_v40  ;;  %v4123_v33 = vld [vmem:[#allocation2 + $0x1c4] sm:$0xf] }
  0x44   :  { %v3653_v44 = vld [vmem:[#allocation2 + $0x740] sm:$0xf]  ;;  %v3526_v48 = vor.u32 %v4269_v43, %v3525_v42  ;;  %v4201_v50 = vld [vmem:[#allocation2 + $0x42c] sm:$0xf0]  ;;  %1693 = vmatpush.bf16.msrb.mxu0 %v3270_v46  ;;  %v2951_v35 = vld [vmem:[#allocation2 + $0x1d0] sm:$0xf0]  ;;  %v4543_v42 = vpack.c.b16 %v339_v25, %v339_v25  ;;  %v2826_v43 = vor.u32 %v4091_v31, %v2823_v32 }
  0x45   :  { %v3253_v49 = vld [vmem:[#allocation2 + $0x420] sm:$0xf]  ;;  %v3654_v52 = vor.u32 %v4301_v45, %v3653_v44  ;;  %v4233_v53 = vld [vmem:[#allocation2 + $0x52c] sm:$0xf0]  ;;  %v4155_v36 = vld [vmem:[#allocation2 + $0x2c4] sm:$0xf]  ;;  %v2954_v45 = vor.u32 %v4123_v33, %v2951_v35 }
  0x46   :  { %v3381_v51 = vld [vmem:[#allocation2 + $0x520] sm:$0xf]  ;;  %v4265_v55 = vld [vmem:[#allocation2 + $0x62c] sm:$0xf0]  ;;  %v3254_v59 = vor.u32 %v4201_v50, %v3253_v49  ;;  %1706 = vmatpush.bf16.msrb.mxu1 %v3398_v47  ;;  %1719 = vmatpush.bf16.msrb.mxu2 %v3526_v48  ;;  %v3079_v37 = vld [vmem:[#allocation2 + $0x2d0] sm:$0xf0] }
  0x47   :  { %v3509_v54 = vld [vmem:[#allocation2 + $0x620] sm:$0xf]  ;;  %v4297_v57 = vld [vmem:[#allocation2 + $0x72c] sm:$0xf0]  ;;  %v3382_v63 = vor.u32 %v4233_v53, %v3381_v51  ;;  %1732 = vmatpush.bf16.msrb.mxu3 %v3654_v52  ;;  %v4187_v39 = vld [vmem:[#allocation2 + $0x3c4] sm:$0xf]  ;;  %v3082_v46 = vor.u32 %v4155_v36, %v3079_v37 }
  0x48   :  { %v3637_v56 = vld [vmem:[#allocation2 + $0x720] sm:$0xf]  ;;  %v4197_v60 = vld [vmem:[#allocation2 + $0x40c] sm:$0xf0]  ;;  %v3510_v0 = vor.u32 %v4265_v55, %v3509_v54  ;;  %1694 = vmatpush.bf16.msrb.mxu0 %v3254_v59  ;;  %v3207_v40 = vld [vmem:[#allocation2 + $0x3d0] sm:$0xf0] }
  0x49   :  { %v3237_v58 = vld [vmem:[#allocation2 + $0x400] sm:$0xf]  ;;  %v4229_v62 = vld [vmem:[#allocation2 + $0x50c] sm:$0xf0]  ;;  %v3638_v4 = vor.u32 %v4297_v57, %v3637_v56  ;;  %v4087_v47 = vld [vmem:[#allocation2 + $0xa4] sm:$0xf]  ;;  %v3210_v50 = vor.u32 %v4187_v39, %v3207_v40 }
  0x4a   :  { %v3365_v61 = vld [vmem:[#allocation2 + $0x500] sm:$0xf]  ;;  %v4261_v2 = vld [vmem:[#allocation2 + $0x60c] sm:$0xf0]  ;;  %v3238_v11 = vor.u32 %v4197_v60, %v3237_v58  ;;  %1707 = vmatpush.bf16.msrb.mxu1 %v3382_v63  ;;  %1720 = vmatpush.bf16.msrb.mxu2 %v3510_v0  ;;  %v2807_v48 = vld [vmem:[#allocation2 + $0xb0] sm:$0xf0] }
  0x4b   :  { %v3493_v1 = vld [vmem:[#allocation2 + $0x600] sm:$0xf]  ;;  %v4293_v6 = vld [vmem:[#allocation2 + $0x70c] sm:$0xf0]  ;;  %v3366_v16 = vor.u32 %v4229_v62, %v3365_v61  ;;  %1733 = vmatpush.bf16.msrb.mxu3 %v3638_v4  ;;  %v4119_v49 = vld [vmem:[#allocation2 + $0x1a4] sm:$0xf]  ;;  %v2810_v56 = vor.u32 %v4087_v47, %v2807_v48 }
  0x4c   :  { %v3621_v5 = vld [vmem:[#allocation2 + $0x700] sm:$0xf]  ;;  %v60_v7 = vld [vmem:[%s4675_s0 + $0x10] sm:$0xff]  ;;  %v3494_v17 = vor.u32 %v4261_v2, %v3493_v1  ;;  %1695 = vmatpush.bf16.msrb.mxu0 %v3238_v11  ;;  %v4151_v52 = vld [vmem:[#allocation2 + $0x2a4] sm:$0xf] }
  0x4d   :  { %v336_v24 = vunpack.c.l.b16 %v60_v7  ;;  %v3622_v26 = vor.u32 %v4293_v6, %v3621_v5  ;;  %v337_v28 = vunpack.c.h.b16 %v60_v7  ;;  %v2935_v51 = vld [vmem:[#allocation2 + $0x1b0] sm:$0xf0]  ;;  %v4183_v54 = vld [vmem:[#allocation2 + $0x3a4] sm:$0xf] }
  0x4e   :  { %1708 = vmatpush.bf16.msrb.mxu1 %v3366_v16  ;;  %1721 = vmatpush.bf16.msrb.mxu2 %v3494_v17  ;;  %v3063_v53 = vld [vmem:[#allocation2 + $0x2b0] sm:$0xf0]  ;;  %v2938_v57 = vor.u32 %v4119_v49, %v2935_v51  ;;  %v4083_v59 = vld [vmem:[#allocation2 + $0x84] sm:$0xf] }
  0x4f   :  { %v4541_v41 = vpack.c.b16 %v336_v24, %v336_v24  ;;  %1734 = vmatpush.bf16.msrb.mxu3 %v3622_v26  ;;  %v4545_v44 = vpack.c.b16 %v337_v28, %v337_v28  ;;  %v3191_v55 = vld [vmem:[#allocation2 + $0x3b0] sm:$0xf0]  ;;  %v3066_v58 = vor.u32 %v4151_v52, %v3063_v53  ;;  %v4115_v61 = vld [vmem:[#allocation2 + $0x184] sm:$0xf] }
  0x50   :  { %1740 = vmatpush.bf16.msra.mxu0 %v2842_v27  ;;  %v2791_v60 = vld [vmem:[#allocation2 + $0x90] sm:$0xf0]  ;;  %v3194_v62 = vor.u32 %v4183_v54, %v3191_v55  ;;  %v4147_v0 = vld [vmem:[#allocation2 + $0x284] sm:$0xf] }
  0x51   :  { %1722 = vmatmul.bf16.vlgmr.msrb.gmra.mxu2 %v4539_v38  ;;  %1696 = vmatmul.bf16.vlgmr.msrb.gmra.mxu0 %v4541_v41  ;;  %v2919_v63 = vld [vmem:[#allocation2 + $0x190] sm:$0xf0]  ;;  %v4179_v2 = vld [vmem:[#allocation2 + $0x384] sm:$0xf]  ;;  %v2794_v4 = vor.u32 %v4083_v59, %v2791_v60 }
  0x52   :  { %1753 = vmatpush.bf16.msra.mxu1 %v2970_v29  ;;  %1766 = vmatpush.bf16.msra.mxu2 %v3098_v30  ;;  %v3047_v1 = vld [vmem:[#allocation2 + $0x290] sm:$0xf0]  ;;  %v2922_v5 = vor.u32 %v4115_v61, %v2919_v63  ;;  %v4079_v7 = vld [vmem:[#allocation2 + $0x64] sm:$0xf] }
  0x53   :  { %1779 = vmatpush.bf16.msra.mxu3 %v3226_v34  ;;  %1709 = vmatmul.bf16.vlgmr.msrb.gmra.mxu1 %v4545_v44  ;;  %v3175_v3 = vld [vmem:[#allocation2 + $0x390] sm:$0xf0]  ;;  %v3050_v6 = vor.u32 %v4147_v0, %v3047_v1  ;;  %v4111_v9 = vld [vmem:[#allocation2 + $0x164] sm:$0xf] }
  0x54   :  { %1735 = vmatmul.bf16.vlgmr.msrb.gmra.mxu3 %v4543_v42  ;;  %1741 = vmatpush.bf16.msra.mxu0 %v2826_v43  ;;  %v2775_v8 = vld [vmem:[#allocation2 + $0x70] sm:$0xf0]  ;;  %v3178_v10 = vor.u32 %v4179_v2, %v3175_v3  ;;  %v4143_v12 = vld [vmem:[#allocation2 + $0x264] sm:$0xf] }
  0x55   :  { %v2903_v11 = vld [vmem:[#allocation2 + $0x170] sm:$0xf0]  ;;  %v4175_v14 = vld [vmem:[#allocation2 + $0x364] sm:$0xf]  ;;  %v2778_v16 = vor.u32 %v4079_v7, %v2775_v8 }
  0x56   :  { %1754 = vmatpush.bf16.msra.mxu1 %v2954_v45  ;;  %1767 = vmatpush.bf16.msra.mxu2 %v3082_v46  ;;  %v3031_v13 = vld [vmem:[#allocation2 + $0x270] sm:$0xf0]  ;;  %v2906_v17 = vor.u32 %v4111_v9, %v2903_v11  ;;  %v4075_v23 = vld [vmem:[#allocation2 + $0x44] sm:$0xf] }
  0x57   :  { %1780 = vmatpush.bf16.msra.mxu3 %v3210_v50  ;;  %v3159_v15 = vld [vmem:[#allocation2 + $0x370] sm:$0xf0]  ;;  %v3034_v21 = vor.u32 %v4143_v12, %v3031_v13  ;;  %v4107_v25 = vld [vmem:[#allocation2 + $0x144] sm:$0xf] }
  0x58   :  { %1742 = vmatpush.bf16.msra.mxu0 %v2810_v56  ;;  %v2759_v24 = vld [vmem:[#allocation2 + $0x50] sm:$0xf0]  ;;  %v3162_v26 = vor.u32 %v4175_v14, %v3159_v15  ;;  %v4139_v28 = vld [vmem:[#allocation2 + $0x244] sm:$0xf] }
  0x59   :  { %v2887_v27 = vld [vmem:[#allocation2 + $0x150] sm:$0xf0]  ;;  %v4171_v30 = vld [vmem:[#allocation2 + $0x344] sm:$0xf]  ;;  %v2762_v32 = vor.u32 %v4075_v23, %v2759_v24 }
  0x5a   :  { %1755 = vmatpush.bf16.msra.mxu1 %v2938_v57  ;;  %1768 = vmatpush.bf16.msra.mxu2 %v3066_v58  ;;  %v3015_v29 = vld [vmem:[#allocation2 + $0x250] sm:$0xf0]  ;;  %v2890_v33 = vor.u32 %v4107_v25, %v2887_v27  ;;  %v4071_v35 = vld [vmem:[#allocation2 + $0x24] sm:$0xf] }
  0x5b   :  { %1781 = vmatpush.bf16.msra.mxu3 %v3194_v62  ;;  %v3143_v31 = vld [vmem:[#allocation2 + $0x350] sm:$0xf0]  ;;  %v3018_v34 = vor.u32 %v4139_v28, %v3015_v29  ;;  %v4103_v37 = vld [vmem:[#allocation2 + $0x124] sm:$0xf] }
  0x5c   :  { %1743 = vmatpush.bf16.msra.mxu0 %v2794_v4  ;;  %v2743_v36 = vld [vmem:[#allocation2 + $0x30] sm:$0xf0]  ;;  %v3146_v39 = vor.u32 %v4171_v30, %v3143_v31  ;;  %v4135_v43 = vld [vmem:[#allocation2 + $0x224] sm:$0xf] }
  0x5d   :  { %v2871_v40 = vld [vmem:[#allocation2 + $0x130] sm:$0xf0]  ;;  %v4167_v46 = vld [vmem:[#allocation2 + $0x324] sm:$0xf]  ;;  %v2746_v48 = vor.u32 %v4071_v35, %v2743_v36 }
  0x5e   :  { %1756 = vmatpush.bf16.msra.mxu1 %v2922_v5  ;;  %1769 = vmatpush.bf16.msra.mxu2 %v3050_v6  ;;  %v2999_v45 = vld [vmem:[#allocation2 + $0x230] sm:$0xf0]  ;;  %v4067_v49 = vld [vmem:[#allocation2 + $0x4] sm:$0xf]  ;;  %v2874_v51 = vor.u32 %v4103_v37, %v2871_v40 }
  0x5f   :  { %1782 = vmatpush.bf16.msra.mxu3 %v3178_v10  ;;  %v3127_v47 = vld [vmem:[#allocation2 + $0x330] sm:$0xf0]  ;;  %v3002_v52 = vor.u32 %v4135_v43, %v2999_v45  ;;  %v4099_v53 = vld [vmem:[#allocation2 + $0x104] sm:$0xf] }
  0x60   :  { %1744 = vmatpush.bf16.msra.mxu0 %v2778_v16  ;;  %v2727_v50 = vld [vmem:[#allocation2 + $0x10] sm:$0xf0]  ;;  %v4131_v55 = vld [vmem:[#allocation2 + $0x204] sm:$0xf]  ;;  %v3130_v56 = vor.u32 %v4167_v46, %v3127_v47 }
  0x61   :  { %v2855_v54 = vld [vmem:[#allocation2 + $0x110] sm:$0xf0]  ;;  %v4163_v58 = vld [vmem:[#allocation2 + $0x304] sm:$0xf]  ;;  %v2730_v63 = vor.u32 %v4067_v49, %v2727_v50 }
  0x62   :  { %1757 = vmatpush.bf16.msra.mxu1 %v2906_v17  ;;  %1770 = vmatpush.bf16.msra.mxu2 %v3034_v21  ;;  %v2983_v57 = vld [vmem:[#allocation2 + $0x210] sm:$0xf0]  ;;  %v4223_v60 = vld [vmem:[#allocation2 + $0x4e4] sm:$0xf]  ;;  %v2858_v3 = vor.u32 %v4099_v53, %v2855_v54 }
  0x63   :  { %1783 = vmatpush.bf16.msra.mxu3 %v3162_v26  ;;  %v3111_v59 = vld [vmem:[#allocation2 + $0x310] sm:$0xf0]  ;;  %v4255_v62 = vld [vmem:[#allocation2 + $0x5e4] sm:$0xf]  ;;  %v2986_v4 = vor.u32 %v4131_v55, %v2983_v57 }
  0x64   :  { %1745 = vmatpush.bf16.msra.mxu0 %v2762_v32  ;;  %v3351_v61 = vld [vmem:[#allocation2 + $0x4f0] sm:$0xf0]  ;;  %v4287_v1 = vld [vmem:[#allocation2 + $0x6e4] sm:$0xf]  ;;  %v3114_v7 = vor.u32 %v4163_v58, %v3111_v59 }
  0x65   :  { %v3479_v0 = vld [vmem:[#allocation2 + $0x5f0] sm:$0xf0]  ;;  %v4319_v5 = vld [vmem:[#allocation2 + $0x7e4] sm:$0xf]  ;;  %v3354_v8 = vor.u32 %v4223_v60, %v3351_v61 }
  0x66   :  { %1758 = vmatpush.bf16.msra.mxu1 %v2890_v33  ;;  %1771 = vmatpush.bf16.msra.mxu2 %v3018_v34  ;;  %v3607_v2 = vld [vmem:[#allocation2 + $0x6f0] sm:$0xf0]  ;;  %v3482_v9 = vor.u32 %v4255_v62, %v3479_v0  ;;  %v4219_v11 = vld [vmem:[#allocation2 + $0x4c4] sm:$0xf] }
  0x67   :  { %1784 = vmatpush.bf16.msra.mxu3 %v3146_v39  ;;  %v3735_v6 = vld [vmem:[#allocation2 + $0x7f0] sm:$0xf0]  ;;  %v3610_v10 = vor.u32 %v4287_v1, %v3607_v2  ;;  %v4251_v13 = vld [vmem:[#allocation2 + $0x5c4] sm:$0xf] }
  0x68   :  { %1746 = vmatpush.bf16.msra.mxu0 %v2746_v48  ;;  %v3335_v12 = vld [vmem:[#allocation2 + $0x4d0] sm:$0xf0]  ;;  %v3738_v14 = vor.u32 %v4319_v5, %v3735_v6  ;;  %v4283_v16 = vld [vmem:[#allocation2 + $0x6c4] sm:$0xf] }
  0x69   :  { %v3463_v15 = vld [vmem:[#allocation2 + $0x5d0] sm:$0xf0]  ;;  %v4315_v21 = vld [vmem:[#allocation2 + $0x7c4] sm:$0xf]  ;;  %v3338_v24 = vor.u32 %v4219_v11, %v3335_v12 }
  0x6a   :  { %1759 = vmatpush.bf16.msra.mxu1 %v2874_v51  ;;  %1772 = vmatpush.bf16.msra.mxu2 %v3002_v52  ;;  %v3591_v17 = vld [vmem:[#allocation2 + $0x6d0] sm:$0xf0]  ;;  %v3466_v25 = vor.u32 %v4251_v13, %v3463_v15  ;;  %v4215_v27 = vld [vmem:[#allocation2 + $0x4a4] sm:$0xf] }
  0x6b   :  { %1785 = vmatpush.bf16.msra.mxu3 %v3130_v56  ;;  %v3719_v23 = vld [vmem:[#allocation2 + $0x7d0] sm:$0xf0]  ;;  %v3594_v26 = vor.u32 %v4283_v16, %v3591_v17  ;;  %v4247_v29 = vld [vmem:[#allocation2 + $0x5a4] sm:$0xf] }
  0x6c   :  { %1747 = vmatpush.bf16.msra.mxu0 %v2730_v63  ;;  %v3319_v28 = vld [vmem:[#allocation2 + $0x4b0] sm:$0xf0]  ;;  %v3722_v30 = vor.u32 %v4315_v21, %v3719_v23  ;;  %v4279_v32 = vld [vmem:[#allocation2 + $0x6a4] sm:$0xf] }
  0x6d   :  { %v3447_v31 = vld [vmem:[#allocation2 + $0x5b0] sm:$0xf0]  ;;  %v4311_v34 = vld [vmem:[#allocation2 + $0x7a4] sm:$0xf]  ;;  %v3322_v36 = vor.u32 %v4215_v27, %v3319_v28 }
  0x6e   :  { %1760 = vmatpush.bf16.msra.mxu1 %v2858_v3  ;;  %1773 = vmatpush.bf16.msra.mxu2 %v2986_v4  ;;  %v3575_v33 = vld [vmem:[#allocation2 + $0x6b0] sm:$0xf0]  ;;  %v3450_v37 = vor.u32 %v4247_v29, %v3447_v31  ;;  %v4211_v40 = vld [vmem:[#allocation2 + $0x484] sm:$0xf] }
  0x6f   :  { %1786 = vmatpush.bf16.msra.mxu3 %v3114_v7  ;;  %v3703_v35 = vld [vmem:[#allocation2 + $0x7b0] sm:$0xf0]  ;;  %1748 = vmatmul.bf16.vlgmr.msra.gmra.mxu0 %v4523_v19  ;;  %v3578_v39 = vor.u32 %v4279_v32, %v3575_v33  ;;  %v4243_v45 = vld [vmem:[#allocation2 + $0x584] sm:$0xf] }
  0x70   :  { %1792 = vmatpush.bf16.msrb.mxu0 %v3354_v8  ;;  %v3303_v43 = vld [vmem:[#allocation2 + $0x490] sm:$0xf0]  ;;  %v3706_v46 = vor.u32 %v4311_v34, %v3703_v35  ;;  %v4275_v48 = vld [vmem:[#allocation2 + $0x684] sm:$0xf] }
  0x71   :  { %1774 = vmatmul.bf16.vlgmr.msra.gmra.mxu2 %v4521_v18  ;;  %1761 = vmatmul.bf16.vlgmr.msra.gmra.mxu1 %v4527_v22  ;;  %v3431_v47 = vld [vmem:[#allocation2 + $0x590] sm:$0xf0]  ;;  %v4307_v50 = vld [vmem:[#allocation2 + $0x784] sm:$0xf]  ;;  %v3306_v52 = vor.u32 %v4211_v40, %v3303_v43  ;;  %v2845_v43 = vld [vmem:[#allocation2 + $0xe8] sm:$0xf] }
  0x72   :  { %1805 = vmatpush.bf16.msrb.mxu1 %v3482_v9  ;;  %1818 = vmatpush.bf16.msrb.mxu2 %v3610_v10  ;;  %v3559_v49 = vld [vmem:[#allocation2 + $0x690] sm:$0xf0]  ;;  %v3434_v53 = vor.u32 %v4243_v45, %v3431_v47  ;;  %v4207_v55 = vld [vmem:[#allocation2 + $0x464] sm:$0xf]  ;;  %v4098_v45 = vld [vmem:[#allocation2 + $0xf4] sm:$0xf0] }
  0x73   :  { %1831 = vmatpush.bf16.msrb.mxu3 %v3738_v14  ;;  %v3687_v51 = vld [vmem:[#allocation2 + $0x790] sm:$0xf0]  ;;  %v3562_v54 = vor.u32 %v4275_v48, %v3559_v49  ;;  %v4239_v57 = vld [vmem:[#allocation2 + $0x564] sm:$0xf]  ;;  %v4130_v48 = vld [vmem:[#allocation2 + $0x1f4] sm:$0xf0] }
  0x74   :  { %1787 = vmatmul.bf16.vlgmr.msra.gmra.mxu3 %v4525_v20  ;;  %1793 = vmatpush.bf16.msrb.mxu0 %v3338_v24  ;;  %v3287_v56 = vld [vmem:[#allocation2 + $0x470] sm:$0xf0]  ;;  %v3690_v58 = vor.u32 %v4307_v50, %v3687_v51  ;;  %v4271_v60 = vld [vmem:[#allocation2 + $0x664] sm:$0xf]  ;;  %v3101_v49 = vld [vmem:[#allocation2 + $0x2e8] sm:$0xf] }
  0x75   :  { %v3415_v59 = vld [vmem:[#allocation2 + $0x570] sm:$0xf0]  ;;  %v4303_v62 = vld [vmem:[#allocation2 + $0x764] sm:$0xf]  ;;  %v3290_v0 = vor.u32 %v4207_v55, %v3287_v56  ;;  %v4162_v50 = vld [vmem:[#allocation2 + $0x2f4] sm:$0xf0]  ;;  %v2846_v56 = vor.u32 %v4098_v45, %v2845_v43 }
  0x76   :  { %1806 = vmatpush.bf16.msrb.mxu1 %v3466_v25  ;;  %1819 = vmatpush.bf16.msrb.mxu2 %v3594_v26  ;;  %v3543_v61 = vld [vmem:[#allocation2 + $0x670] sm:$0xf0]  ;;  %v3418_v1 = vor.u32 %v4239_v57, %v3415_v59  ;;  %v4203_v3 = vld [vmem:[#allocation2 + $0x444] sm:$0xf]  ;;  %v2829_v59 = vld [vmem:[#allocation2 + $0xc8] sm:$0xf] }
  0x77   :  { %1832 = vmatpush.bf16.msrb.mxu3 %v3722_v30  ;;  %v3671_v63 = vld [vmem:[#allocation2 + $0x770] sm:$0xf0]  ;;  %v3546_v2 = vor.u32 %v4271_v60, %v3543_v61  ;;  %v4235_v5 = vld [vmem:[#allocation2 + $0x544] sm:$0xf]  ;;  %v4094_v60 = vld [vmem:[#allocation2 + $0xd4] sm:$0xf0] }
  0x78   :  { %1794 = vmatpush.bf16.msrb.mxu0 %v3322_v36  ;;  %v3271_v4 = vld [vmem:[#allocation2 + $0x450] sm:$0xf0]  ;;  %v3674_v6 = vor.u32 %v4303_v62, %v3671_v63  ;;  %v4267_v8 = vld [vmem:[#allocation2 + $0x644] sm:$0xf]  ;;  %v2957_v61 = vld [vmem:[#allocation2 + $0x1c8] sm:$0xf] }
  0x79   :  { %v3399_v7 = vld [vmem:[#allocation2 + $0x550] sm:$0xf0]  ;;  %v4299_v10 = vld [vmem:[#allocation2 + $0x744] sm:$0xf]  ;;  %v3274_v12 = vor.u32 %v4203_v3, %v3271_v4  ;;  %v4126_v63 = vld [vmem:[#allocation2 + $0x1d4] sm:$0xf0]  ;;  %v2830_v4 = vor.u32 %v4094_v60, %v2829_v59 }
  0x7a   :  { %1807 = vmatpush.bf16.msrb.mxu1 %v3450_v37  ;;  %1820 = vmatpush.bf16.msrb.mxu2 %v3578_v39  ;;  %v3527_v9 = vld [vmem:[#allocation2 + $0x650] sm:$0xf0]  ;;  %v3402_v13 = vor.u32 %v4235_v5, %v3399_v7  ;;  %v4199_v15 = vld [vmem:[#allocation2 + $0x424] sm:$0xf]  ;;  %v4190_v3 = vld [vmem:[#allocation2 + $0x3d4] sm:$0xf0]  ;;  %v2958_v5 = vor.u32 %v4126_v63, %v2957_v61 }
  0x7b   :  { %1833 = vmatpush.bf16.msrb.mxu3 %v3706_v46  ;;  %v3655_v11 = vld [vmem:[#allocation2 + $0x750] sm:$0xf0]  ;;  %v3530_v14 = vor.u32 %v4267_v8, %v3527_v9  ;;  %v4231_v17 = vld [vmem:[#allocation2 + $0x524] sm:$0xf]  ;;  %v2973_v46 = vld [vmem:[#allocation2 + $0x1e8] sm:$0xf] }
  0x7c   :  { %1795 = vmatpush.bf16.msrb.mxu0 %v3306_v52  ;;  %v3255_v16 = vld [vmem:[#allocation2 + $0x430] sm:$0xf0]  ;;  %v3658_v21 = vor.u32 %v4299_v10, %v3655_v11  ;;  %v4263_v24 = vld [vmem:[#allocation2 + $0x624] sm:$0xf]  ;;  %v2974_v57 = vor.u32 %v4130_v48, %v2973_v46  ;;  %v2813_v7 = vld [vmem:[#allocation2 + $0xa8] sm:$0xf] }
  0x7d   :  { %v3383_v23 = vld [vmem:[#allocation2 + $0x530] sm:$0xf0]  ;;  %v4295_v26 = vld [vmem:[#allocation2 + $0x724] sm:$0xf]  ;;  %v3258_v28 = vor.u32 %v4199_v15, %v3255_v16  ;;  %v4090_v8 = vld [vmem:[#allocation2 + $0xb4] sm:$0xf0] }
  0x7e   :  { %1808 = vmatpush.bf16.msrb.mxu1 %v3434_v53  ;;  %1821 = vmatpush.bf16.msrb.mxu2 %v3562_v54  ;;  %v3511_v25 = vld [vmem:[#allocation2 + $0x630] sm:$0xf0]  ;;  %v4195_v29 = vld [vmem:[#allocation2 + $0x404] sm:$0xf]  ;;  %v3386_v31 = vor.u32 %v4231_v17, %v3383_v23  ;;  %v3229_v53 = vld [vmem:[#allocation2 + $0x3e8] sm:$0xf]  ;;  %v2814_v16 = vor.u32 %v4090_v8, %v2813_v7 }
  0x7f   :  { %1834 = vmatpush.bf16.msrb.mxu3 %v3690_v58  ;;  %v3639_v27 = vld [vmem:[#allocation2 + $0x730] sm:$0xf0]  ;;  %v3514_v32 = vor.u32 %v4263_v24, %v3511_v25  ;;  %v4227_v33 = vld [vmem:[#allocation2 + $0x504] sm:$0xf]  ;;  %v4194_v54 = vld [vmem:[#allocation2 + $0x3f4] sm:$0xf0]  ;;  %v3102_v58 = vor.u32 %v4162_v50, %v3101_v49 }
  0x80   :  { %1796 = vmatpush.bf16.msrb.mxu0 %v3290_v0  ;;  %v3239_v30 = vld [vmem:[#allocation2 + $0x410] sm:$0xf0]  ;;  %v4259_v35 = vld [vmem:[#allocation2 + $0x604] sm:$0xf]  ;;  %v3642_v36 = vor.u32 %v4295_v26, %v3639_v27  ;;  %v3230_v62 = vor.u32 %v4194_v54, %v3229_v53  ;;  %v3085_v0 = vld [vmem:[#allocation2 + $0x2c8] sm:$0xf] }
  0x81   :  { %v3367_v34 = vld [vmem:[#allocation2 + $0x510] sm:$0xf0]  ;;  %v4291_v39 = vld [vmem:[#allocation2 + $0x704] sm:$0xf]  ;;  %v3242_v47 = vor.u32 %v4195_v29, %v3239_v30  ;;  %v2941_v9 = vld [vmem:[#allocation2 + $0x1a8] sm:$0xf] }
  0x82   :  { %1809 = vmatpush.bf16.msrb.mxu1 %v3418_v1  ;;  %1822 = vmatpush.bf16.msrb.mxu2 %v3546_v2  ;;  %v3495_v37 = vld [vmem:[#allocation2 + $0x610] sm:$0xf0]  ;;  %v3370_v51 = vor.u32 %v4227_v33, %v3367_v34  ;;  %v4158_v1 = vld [vmem:[#allocation2 + $0x2d4] sm:$0xf0]  ;;  %v3213_v2 = vld [vmem:[#allocation2 + $0x3c8] sm:$0xf] }
  0x83   :  { %1835 = vmatpush.bf16.msrb.mxu3 %v3674_v6  ;;  %v3623_v40 = vld [vmem:[#allocation2 + $0x710] sm:$0xf0]  ;;  %v3498_v52 = vor.u32 %v4259_v35, %v3495_v37  ;;  %v3086_v6 = vor.u32 %v4158_v1, %v3085_v0  ;;  %v3214_v10 = vor.u32 %v4190_v3, %v3213_v2  ;;  %v4122_v11 = vld [vmem:[#allocation2 + $0x1b4] sm:$0xf0]  ;;  %v2797_v23 = vld [vmem:[#allocation2 + $0x88] sm:$0xf] }
  0x84   :  { %1797 = vmatpush.bf16.msrb.mxu0 %v3274_v12  ;;  %v3626_v55 = vor.u32 %v4291_v39, %v3623_v40  ;;  %v3069_v12 = vld [vmem:[#allocation2 + $0x2a8] sm:$0xf]  ;;  %v4186_v15 = vld [vmem:[#allocation2 + $0x3b4] sm:$0xf0]  ;;  %v2942_v17 = vor.u32 %v4122_v11, %v2941_v9 }
  0x85   :  { %v4086_v24 = vld [vmem:[#allocation2 + $0x94] sm:$0xf0]  ;;  %v2925_v25 = vld [vmem:[#allocation2 + $0x188] sm:$0xf] }
  0x86   :  { %1810 = vmatpush.bf16.msrb.mxu1 %v3402_v13  ;;  %1823 = vmatpush.bf16.msrb.mxu2 %v3530_v14  ;;  %v4154_v13 = vld [vmem:[#allocation2 + $0x2b4] sm:$0xf0]  ;;  %v3197_v14 = vld [vmem:[#allocation2 + $0x3a8] sm:$0xf] }
  0x87   :  { %1836 = vmatpush.bf16.msrb.mxu3 %v3658_v21  ;;  %v3070_v21 = vor.u32 %v4154_v13, %v3069_v12  ;;  %v3198_v26 = vor.u32 %v4186_v15, %v3197_v14  ;;  %v4118_v27 = vld [vmem:[#allocation2 + $0x194] sm:$0xf0]  ;;  %v3181_v30 = vld [vmem:[#allocation2 + $0x388] sm:$0xf] }
  0x88   :  { %1798 = vmatpush.bf16.msrb.mxu0 %v3258_v28  ;;  %v3053_v28 = vld [vmem:[#allocation2 + $0x288] sm:$0xf]  ;;  %v4150_v29 = vld [vmem:[#allocation2 + $0x294] sm:$0xf0]  ;;  %v2926_v33 = vor.u32 %v4118_v27, %v2925_v25 }
  0x89   :  { %v3054_v34 = vor.u32 %v4150_v29, %v3053_v28  ;;  %v2781_v35 = vld [vmem:[#allocation2 + $0x68] sm:$0xf]  ;;  %v4114_v40 = vld [vmem:[#allocation2 + $0x174] sm:$0xf0] }
  0x8a   :  { %1811 = vmatpush.bf16.msrb.mxu1 %v3386_v31  ;;  %1824 = vmatpush.bf16.msrb.mxu2 %v3514_v32  ;;  %v4182_v31 = vld [vmem:[#allocation2 + $0x394] sm:$0xf0]  ;;  %v2798_v32 = vor.u32 %v4086_v24, %v2797_v23  ;;  %v2909_v37 = vld [vmem:[#allocation2 + $0x168] sm:$0xf] }
  0x8b   :  { %1837 = vmatpush.bf16.msrb.mxu3 %v3642_v36  ;;  %v4082_v36 = vld [vmem:[#allocation2 + $0x74] sm:$0xf0]  ;;  %v3182_v39 = vor.u32 %v4182_v31, %v3181_v30  ;;  %v3037_v43 = vld [vmem:[#allocation2 + $0x268] sm:$0xf]  ;;  %v2910_v49 = vor.u32 %v4114_v40, %v2909_v37 }
  0x8c   :  { %1799 = vmatpush.bf16.msrb.mxu0 %v3242_v47  ;;  %v4146_v45 = vld [vmem:[#allocation2 + $0x274] sm:$0xf0]  ;;  %v3165_v46 = vld [vmem:[#allocation2 + $0x368] sm:$0xf]  ;;  %v2782_v48 = vor.u32 %v4082_v36, %v2781_v35 }
  0x8d   :  { %v4178_v47 = vld [vmem:[#allocation2 + $0x374] sm:$0xf0]  ;;  %v3038_v50 = vor.u32 %v4146_v45, %v3037_v43  ;;  %v2893_v53 = vld [vmem:[#allocation2 + $0x148] sm:$0xf] }
  0x8e   :  { %1812 = vmatpush.bf16.msrb.mxu1 %v3370_v51  ;;  %1825 = vmatpush.bf16.msrb.mxu2 %v3498_v52  ;;  %v2765_v51 = vld [vmem:[#allocation2 + $0x48] sm:$0xf]  ;;  %v4078_v52 = vld [vmem:[#allocation2 + $0x54] sm:$0xf0]  ;;  %v3166_v54 = vor.u32 %v4178_v47, %v3165_v46 }
  0x8f   :  { %1838 = vmatpush.bf16.msrb.mxu3 %v3626_v55  ;;  %1800 = vmatmul.bf16.vlgmr.msrb.gmra.mxu0 %v4541_v41  ;;  %v4110_v55 = vld [vmem:[#allocation2 + $0x154] sm:$0xf0]  ;;  %v2766_v60 = vor.u32 %v4078_v52, %v2765_v51  ;;  %v2749_v63 = vld [vmem:[#allocation2 + $0x28] sm:$0xf] }
  0x90   :  { %1844 = vmatpush.bf16.msra.mxu0 %v2846_v56  ;;  %v3021_v56 = vld [vmem:[#allocation2 + $0x248] sm:$0xf]  ;;  %v4174_v59 = vld [vmem:[#allocation2 + $0x354] sm:$0xf0]  ;;  %v2894_v61 = vor.u32 %v4110_v55, %v2893_v53 }
  0x91   :  { %1826 = vmatmul.bf16.vlgmr.msrb.gmra.mxu2 %v4539_v38  ;;  %1813 = vmatmul.bf16.vlgmr.msrb.gmra.mxu1 %v4545_v44  ;;  %v4074_v0 = vld [vmem:[#allocation2 + $0x34] sm:$0xf0]  ;;  %v2877_v1 = vld [vmem:[#allocation2 + $0x128] sm:$0xf] }
  0x92   :  { %1857 = vmatpush.bf16.msra.mxu1 %v2974_v57  ;;  %1870 = vmatpush.bf16.msra.mxu2 %v3102_v58  ;;  %v4142_v57 = vld [vmem:[#allocation2 + $0x254] sm:$0xf0]  ;;  %v3149_v58 = vld [vmem:[#allocation2 + $0x348] sm:$0xf]  ;;  %v2750_v8 = vor.u32 %v4074_v0, %v2749_v63 }
  0x93   :  { %1883 = vmatpush.bf16.msra.mxu3 %v3230_v62  ;;  %v3022_v62 = vor.u32 %v4142_v57, %v3021_v56  ;;  %v3150_v2 = vor.u32 %v4174_v59, %v3149_v58  ;;  %v4106_v3 = vld [vmem:[#allocation2 + $0x134] sm:$0xf0]  ;;  %v2733_v9 = vld [vmem:[#allocation2 + $0x8] sm:$0xf] }
  0x94   :  { %1839 = vmatmul.bf16.vlgmr.msrb.gmra.mxu3 %v4543_v42  ;;  %1845 = vmatpush.bf16.msra.mxu0 %v2830_v4  ;;  %v3005_v4 = vld [vmem:[#allocation2 + $0x228] sm:$0xf]  ;;  %v4170_v7 = vld [vmem:[#allocation2 + $0x334] sm:$0xf0]  ;;  %v2878_v11 = vor.u32 %v4106_v3, %v2877_v1 }
  0x95   :  { %v2861_v13 = vld [vmem:[#allocation2 + $0x108] sm:$0xf]  ;;  %v4102_v14 = vld [vmem:[#allocation2 + $0x114] sm:$0xf0] }
  0x96   :  { %1858 = vmatpush.bf16.msra.mxu1 %v2958_v5  ;;  %1871 = vmatpush.bf16.msra.mxu2 %v3086_v6  ;;  %v4138_v5 = vld [vmem:[#allocation2 + $0x234] sm:$0xf0]  ;;  %v3133_v6 = vld [vmem:[#allocation2 + $0x328] sm:$0xf]  ;;  %v2862_v31 = vor.u32 %v4102_v14, %v2861_v13 }
  0x97   :  { %1884 = vmatpush.bf16.msra.mxu3 %v3214_v10  ;;  %v4070_v10 = vld [vmem:[#allocation2 + $0x14] sm:$0xf0]  ;;  %v3006_v12 = vor.u32 %v4138_v5, %v3005_v4  ;;  %v2989_v15 = vld [vmem:[#allocation2 + $0x208] sm:$0xf] }
  0x98   :  { %1846 = vmatpush.bf16.msra.mxu0 %v2814_v16  ;;  %v3134_v16 = vor.u32 %v4170_v7, %v3133_v6  ;;  %v4166_v23 = vld [vmem:[#allocation2 + $0x314] sm:$0xf0]  ;;  %v3357_v24 = vld [vmem:[#allocation2 + $0x4e8] sm:$0xf]  ;;  %v2734_v27 = vor.u32 %v4070_v10, %v2733_v9 }
  0x99   :  { %v4226_v25 = vld [vmem:[#allocation2 + $0x4f4] sm:$0xf0]  ;;  %v3613_v29 = vld [vmem:[#allocation2 + $0x6e8] sm:$0xf] }
  0x9a   :  { %1859 = vmatpush.bf16.msra.mxu1 %v2942_v17  ;;  %1872 = vmatpush.bf16.msra.mxu2 %v3070_v21  ;;  %v4134_v17 = vld [vmem:[#allocation2 + $0x214] sm:$0xf0]  ;;  %v3117_v21 = vld [vmem:[#allocation2 + $0x308] sm:$0xf]  ;;  %v3358_v36 = vor.u32 %v4226_v25, %v3357_v24 }
  0x9b   :  { %1885 = vmatpush.bf16.msra.mxu3 %v3198_v26  ;;  %v3485_v26 = vld [vmem:[#allocation2 + $0x5e8] sm:$0xf]  ;;  %v4258_v28 = vld [vmem:[#allocation2 + $0x5f4] sm:$0xf0]  ;;  %v3118_v35 = vor.u32 %v4166_v23, %v3117_v21 }
  0x9c   :  { %1847 = vmatpush.bf16.msra.mxu0 %v2798_v32  ;;  %v4290_v30 = vld [vmem:[#allocation2 + $0x6f4] sm:$0xf0]  ;;  %v2990_v32 = vor.u32 %v4134_v17, %v2989_v15  ;;  %v3486_v37 = vor.u32 %v4258_v28, %v3485_v26  ;;  %v3341_v40 = vld [vmem:[#allocation2 + $0x4c8] sm:$0xf]  ;;  %v4566_v26 = vld [vmem:[%s4677_s2] sm:$0xf] }
  0x9d   :  { %v4222_v43 = vld [vmem:[#allocation2 + $0x4d4] sm:$0xf0]  ;;  %v3469_v45 = vld [vmem:[#allocation2 + $0x5c8] sm:$0xf] }
  0x9e   :  { %1860 = vmatpush.bf16.msra.mxu1 %v2926_v33  ;;  %1873 = vmatpush.bf16.msra.mxu2 %v3054_v34  ;;  %v3741_v33 = vld [vmem:[#allocation2 + $0x7e8] sm:$0xf]  ;;  %v4322_v34 = vld [vmem:[#allocation2 + $0x7f4] sm:$0xf0]  ;;  %v3342_v52 = vor.u32 %v4222_v43, %v3341_v40 }
  0x9f   :  { %1886 = vmatpush.bf16.msra.mxu3 %v3182_v39  ;;  %v3614_v39 = vor.u32 %v4290_v30, %v3613_v29  ;;  %v3742_v46 = vor.u32 %v4322_v34, %v3741_v33  ;;  %v4254_v47 = vld [vmem:[#allocation2 + $0x5d4] sm:$0xf0]  ;;  %v3325_v55 = vld [vmem:[#allocation2 + $0x4a8] sm:$0xf] }
  0xa0   :  { %1848 = vmatpush.bf16.msra.mxu0 %v2782_v48  ;;  %v3597_v48 = vld [vmem:[#allocation2 + $0x6c8] sm:$0xf]  ;;  %v4318_v51 = vld [vmem:[#allocation2 + $0x7d4] sm:$0xf0]  ;;  %v3470_v53 = vor.u32 %v4254_v47, %v3469_v45 }
  0xa1   :  { %v4218_v56 = vld [vmem:[#allocation2 + $0x4b4] sm:$0xf0]  ;;  %v3453_v57 = vld [vmem:[#allocation2 + $0x5a8] sm:$0xf] }
  0xa2   :  { %1861 = vmatpush.bf16.msra.mxu1 %v2910_v49  ;;  %1874 = vmatpush.bf16.msra.mxu2 %v3038_v50  ;;  %v4286_v49 = vld [vmem:[#allocation2 + $0x6d4] sm:$0xf0]  ;;  %v3725_v50 = vld [vmem:[#allocation2 + $0x7c8] sm:$0xf]  ;;  %v3326_v0 = vor.u32 %v4218_v56, %v3325_v55 }
  0xa3   :  { %1887 = vmatpush.bf16.msra.mxu3 %v3166_v54  ;;  %v3598_v54 = vor.u32 %v4286_v49, %v3597_v48  ;;  %v3726_v58 = vor.u32 %v4318_v51, %v3725_v50  ;;  %v4250_v59 = vld [vmem:[#allocation2 + $0x5b4] sm:$0xf0]  ;;  %v3309_v3 = vld [vmem:[#allocation2 + $0x488] sm:$0xf] }
  0xa4   :  { %1849 = vmatpush.bf16.msra.mxu0 %v2766_v60  ;;  %v3581_v60 = vld [vmem:[#allocation2 + $0x6a8] sm:$0xf]  ;;  %v4314_v63 = vld [vmem:[#allocation2 + $0x7b4] sm:$0xf0]  ;;  %v3454_v1 = vor.u32 %v4250_v59, %v3453_v57 }
  0xa5   :  { %v4214_v4 = vld [vmem:[#allocation2 + $0x494] sm:$0xf0]  ;;  %v3437_v5 = vld [vmem:[#allocation2 + $0x588] sm:$0xf] }
  0xa6   :  { %1862 = vmatpush.bf16.msra.mxu1 %v2894_v61  ;;  %1875 = vmatpush.bf16.msra.mxu2 %v3022_v62  ;;  %v4282_v61 = vld [vmem:[#allocation2 + $0x6b4] sm:$0xf0]  ;;  %v3709_v62 = vld [vmem:[#allocation2 + $0x7a8] sm:$0xf] }
  0xa7   :  { %1888 = vmatpush.bf16.msra.mxu3 %v3150_v2  ;;  %v3582_v2 = vor.u32 %v4282_v61, %v3581_v60  ;;  %v3710_v6 = vor.u32 %v4314_v63, %v3709_v62  ;;  %v4246_v7 = vld [vmem:[#allocation2 + $0x594] sm:$0xf0]  ;;  %v3693_v10 = vld [vmem:[#allocation2 + $0x788] sm:$0xf] }
  0xa8   :  { %1850 = vmatpush.bf16.msra.mxu0 %v2750_v8  ;;  %v3565_v8 = vld [vmem:[#allocation2 + $0x688] sm:$0xf]  ;;  %v4278_v9 = vld [vmem:[#allocation2 + $0x694] sm:$0xf0]  ;;  %v3438_v14 = vor.u32 %v4246_v7, %v3437_v5 }
  0xa9   :  { %v3293_v13 = vld [vmem:[#allocation2 + $0x468] sm:$0xf]  ;;  %v3566_v15 = vor.u32 %v4278_v9, %v3565_v8  ;;  %v4242_v21 = vld [vmem:[#allocation2 + $0x574] sm:$0xf0] }
  0xaa   :  { %1863 = vmatpush.bf16.msra.mxu1 %v2878_v11  ;;  %1876 = vmatpush.bf16.msra.mxu2 %v3006_v12  ;;  %v4310_v11 = vld [vmem:[#allocation2 + $0x794] sm:$0xf0]  ;;  %v3310_v12 = vor.u32 %v4214_v4, %v3309_v3  ;;  %v3421_v17 = vld [vmem:[#allocation2 + $0x568] sm:$0xf] }
  0xab   :  { %1889 = vmatpush.bf16.msra.mxu3 %v3134_v16  ;;  %v4210_v16 = vld [vmem:[#allocation2 + $0x474] sm:$0xf0]  ;;  %v3694_v23 = vor.u32 %v4310_v11, %v3693_v10  ;;  %v3549_v24 = vld [vmem:[#allocation2 + $0x668] sm:$0xf] }
  0xac   :  { %1851 = vmatpush.bf16.msra.mxu0 %v2734_v27  ;;  %v4274_v25 = vld [vmem:[#allocation2 + $0x674] sm:$0xf0]  ;;  %v3677_v27 = vld [vmem:[#allocation2 + $0x768] sm:$0xf]  ;;  %v3294_v29 = vor.u32 %v4210_v16, %v3293_v13  ;;  %v4096_v13 = vld [vmem:[#allocation2 + $0xec] sm:$0xf] }
  0xad   :  { %v4306_v28 = vld [vmem:[#allocation2 + $0x774] sm:$0xf0]  ;;  %v3277_v30 = vld [vmem:[#allocation2 + $0x448] sm:$0xf] }
  0xae   :  { %1864 = vmatpush.bf16.msra.mxu1 %v2862_v31  ;;  %1877 = vmatpush.bf16.msra.mxu2 %v2990_v32  ;;  %v3422_v31 = vor.u32 %v4242_v21, %v3421_v17  ;;  %v3550_v32 = vor.u32 %v4274_v25, %v3549_v24  ;;  %v4206_v33 = vld [vmem:[#allocation2 + $0x454] sm:$0xf0]  ;;  %v3405_v34 = vld [vmem:[#allocation2 + $0x548] sm:$0xf]  ;;  %v2975_v17 = vld [vmem:[#allocation2 + $0x1f8] sm:$0xf0] }
  0xaf   :  { %1890 = vmatpush.bf16.msra.mxu3 %v3118_v35  ;;  %1852 = vmatmul.bf16.vlgmr.msra.gmra.mxu0 %v4523_v19  ;;  %v320_v35 = vperm.slane %v4566_v26, 0  ;;  %v4270_v40 = vld [vmem:[#allocation2 + $0x654] sm:$0xf0]  ;;  %v3661_v43 = vld [vmem:[#allocation2 + $0x748] sm:$0xf] }
  0xb0   :  { %1896 = vmatpush.bf16.msrb.mxu0 %v3358_v36  ;;  %v3678_v36 = vor.u32 %v4306_v28, %v3677_v27  ;;  %v4302_v45 = vld [vmem:[#allocation2 + $0x754] sm:$0xf0]  ;;  %v3261_v50 = vld [vmem:[#allocation2 + $0x428] sm:$0xf]  ;;  %v4160_v21 = vld [vmem:[#allocation2 + $0x2ec] sm:$0xf] }
  0xb1   :  { %1878 = vmatmul.bf16.vlgmr.msra.gmra.mxu2 %v4521_v18  ;;  %1865 = vmatmul.bf16.vlgmr.msra.gmra.mxu1 %v4527_v22  ;;  %v4202_v51 = vld [vmem:[#allocation2 + $0x434] sm:$0xf0]  ;;  %v3662_v55 = vor.u32 %v4302_v45, %v3661_v43  ;;  %v3517_v57 = vld [vmem:[#allocation2 + $0x628] sm:$0xf]  ;;  %v2959_v43 = vld [vmem:[#allocation2 + $0x1d8] sm:$0xf0] }
  0xb2   :  { %1909 = vmatpush.bf16.msrb.mxu1 %v3486_v37  ;;  %1922 = vmatpush.bf16.msrb.mxu2 %v3614_v39  ;;  %v4238_v37 = vld [vmem:[#allocation2 + $0x554] sm:$0xf0]  ;;  %v3533_v39 = vld [vmem:[#allocation2 + $0x648] sm:$0xf]  ;;  %v3262_v62 = vor.u32 %v4202_v51, %v3261_v50  ;;  %v4156_v45 = vld [vmem:[#allocation2 + $0x2cc] sm:$0xf] }
  0xb3   :  { %1935 = vmatpush.bf16.msrb.mxu3 %v3742_v46  ;;  %v3278_v46 = vor.u32 %v4206_v33, %v3277_v30  ;;  %v3406_v48 = vor.u32 %v4238_v37, %v3405_v34  ;;  %v3534_v49 = vor.u32 %v4270_v40, %v3533_v39  ;;  %v4234_v56 = vld [vmem:[#allocation2 + $0x534] sm:$0xf0]  ;;  %v3645_v59 = vld [vmem:[#allocation2 + $0x728] sm:$0xf]  ;;  %v3231_v30 = vld [vmem:[#allocation2 + $0x3f8] sm:$0xf0] }
  0xb4   :  { %1891 = vmatmul.bf16.vlgmr.msra.gmra.mxu3 %v4525_v20  ;;  %1897 = vmatpush.bf16.msrb.mxu0 %v3342_v52  ;;  %v3389_v52 = vld [vmem:[#allocation2 + $0x528] sm:$0xf]  ;;  %v4298_v60 = vld [vmem:[#allocation2 + $0x734] sm:$0xf0]  ;;  %v2831_v37 = vld [vmem:[#allocation2 + $0xd8] sm:$0xf0] }
  0xb5   :  { %v3245_v63 = vld [vmem:[#allocation2 + $0x408] sm:$0xf]  ;;  %v4230_v4 = vld [vmem:[#allocation2 + $0x514] sm:$0xf0]  ;;  %v3646_v7 = vor.u32 %v4298_v60, %v3645_v59  ;;  %v4124_v39 = vld [vmem:[#allocation2 + $0x1cc] sm:$0xf] }
  0xb6   :  { %1910 = vmatpush.bf16.msrb.mxu1 %v3470_v53  ;;  %1923 = vmatpush.bf16.msrb.mxu2 %v3598_v54  ;;  %v3373_v3 = vld [vmem:[#allocation2 + $0x508] sm:$0xf]  ;;  %v4262_v8 = vld [vmem:[#allocation2 + $0x614] sm:$0xf0]  ;;  %v4152_v59 = vld [vmem:[#allocation2 + $0x2ac] sm:$0xf] }
  0xb7   :  { %1936 = vmatpush.bf16.msrb.mxu3 %v3726_v58  ;;  %v4266_v58 = vld [vmem:[#allocation2 + $0x634] sm:$0xf0]  ;;  %v3501_v5 = vld [vmem:[#allocation2 + $0x608] sm:$0xf]  ;;  %v3374_v27 = vor.u32 %v4230_v4, %v3373_v3  ;;  %v3071_v60 = vld [vmem:[#allocation2 + $0x2b8] sm:$0xf0] }
  0xb8   :  { %1898 = vmatpush.bf16.msrb.mxu0 %v3326_v0  ;;  %v4198_v0 = vld [vmem:[#allocation2 + $0x414] sm:$0xf0]  ;;  %v3629_v9 = vld [vmem:[#allocation2 + $0x708] sm:$0xf]  ;;  %v3502_v28 = vor.u32 %v4262_v8, %v3501_v5  ;;  %v2799_v3 = vld [vmem:[#allocation2 + $0x98] sm:$0xf0] }
  0xb9   :  { %v4294_v10 = vld [vmem:[#allocation2 + $0x714] sm:$0xf0]  ;;  %v3246_v16 = vor.u32 %v4198_v0, %v3245_v63  ;;  %v4116_v4 = vld [vmem:[#allocation2 + $0x18c] sm:$0xf]  ;;  %v3055_v8 = vld [vmem:[#allocation2 + $0x298] sm:$0xf0] }
  0xba   :  { %1911 = vmatpush.bf16.msrb.mxu1 %v3454_v1  ;;  %1924 = vmatpush.bf16.msrb.mxu2 %v3582_v2  ;;  %v1645_v47 = vpop.f32.mrf.mxu0  ;;  %v1658_v54 = vpop.f32.mrf.mxu1  ;;  %v3390_v1 = vor.u32 %v4234_v56, %v3389_v52  ;;  %v3518_v2 = vor.u32 %v4266_v58, %v3517_v57  ;;  %v2962_v52 = vor.u32 %v4124_v39, %v2959_v43  ;;  %v4120_v56 = vld [vmem:[#allocation2 + $0x1ac] sm:$0xf]  ;;  %v2943_v58 = vld [vmem:[#allocation2 + $0x1b8] sm:$0xf0] }
  0xbb   :  { %1937 = vmatpush.bf16.msrb.mxu3 %v3710_v6  ;;  %v1646_v53 = vadd.f32 %v1645_v47, %v320_v35  ;;  %v1671_v6 = vpop.f32.mrf.mxu2  ;;  %v4188_v47 = vld [vmem:[#allocation2 + $0x3cc] sm:$0xf]  ;;  %v2946_v0 = vor.u32 %v4120_v56, %v2943_v58  ;;  %v2895_v43 = vld [vmem:[#allocation2 + $0x158] sm:$0xf0] }
  0xbc   :  { %1899 = vmatpush.bf16.msrb.mxu0 %v3310_v12  ;;  %v1684_v12 = vpop.f32.mrf.mxu3  ;;  %v4108_v39 = vld [vmem:[#allocation2 + $0x14c] sm:$0xf] }
  0xbd   :  { %v1659_v61 = vadd.f32 %v1658_v54, %v1646_v53  ;;  %v4088_v54 = vld [vmem:[#allocation2 + $0xac] sm:$0xf] }
  0xbe   :  { %1912 = vmatpush.bf16.msrb.mxu1 %v3438_v14  ;;  %1925 = vmatpush.bf16.msrb.mxu2 %v3566_v15  ;;  %v2847_v14 = vld [vmem:[#allocation2 + $0xf8] sm:$0xf0]  ;;  %v4128_v15 = vld [vmem:[#allocation2 + $0x1ec] sm:$0xf] }
  0xbf   :  { %1938 = vmatpush.bf16.msrb.mxu3 %v3694_v23  ;;  %v1672_v11 = vadd.f32 %v1671_v6, %v1659_v61  ;;  %v3103_v23 = vld [vmem:[#allocation2 + $0x2f8] sm:$0xf0]  ;;  %v2850_v33 = vor.u32 %v4096_v13, %v2847_v14  ;;  %v2978_v34 = vor.u32 %v4128_v15, %v2975_v17  ;;  %v4184_v61 = vld [vmem:[#allocation2 + $0x3ac] sm:$0xf] }
  0xc0   :  { %1900 = vmatpush.bf16.msrb.mxu0 %v3294_v29  ;;  %v4192_v29 = vld [vmem:[#allocation2 + $0x3ec] sm:$0xf]  ;;  %v3106_v35 = vor.u32 %v4160_v21, %v3103_v23  ;;  %v2927_v6 = vld [vmem:[#allocation2 + $0x198] sm:$0xf0] }
  0xc1   :  { %v4569_v24 = vadd.f32 %v1684_v12, %v1672_v11  ;;  %v3234_v40 = vor.u32 %v4192_v29, %v3231_v30  ;;  %v2930_v13 = vor.u32 %v4116_v4, %v2927_v6  ;;  %v4080_v15 = vld [vmem:[#allocation2 + $0x6c] sm:$0xf]  ;;  %v3039_v29 = vld [vmem:[#allocation2 + $0x278] sm:$0xf0] }
  0xc2   :  { %1913 = vmatpush.bf16.msrb.mxu1 %v3422_v31  ;;  %1926 = vmatpush.bf16.msrb.mxu2 %v3550_v32  ;;  %v1647_v25 = vpop.f32.mrf.mxu0  ;;  %v1660_v31 = vpop.f32.mrf.mxu1  ;;  %v3630_v32 = vor.u32 %v4294_v10, %v3629_v9  ;;  %v4180_v9 = vld [vmem:[#allocation2 + $0x38c] sm:$0xf]  ;;  %v3183_v10 = vld [vmem:[#allocation2 + $0x398] sm:$0xf0] }
  0xc3   :  { %1939 = vmatpush.bf16.msrb.mxu3 %v3678_v36  ;;  %v4092_v36 = vld [vmem:[#allocation2 + $0xcc] sm:$0xf]  ;;  %v3186_v25 = vor.u32 %v4180_v9, %v3183_v10  ;;  %v3167_v31 = vld [vmem:[#allocation2 + $0x378] sm:$0xf0] }
  0xc4   :  { %1901 = vmatpush.bf16.msrb.mxu0 %v3278_v46  ;;  %v3087_v46 = vld [vmem:[#allocation2 + $0x2d8] sm:$0xf0]  ;;  %v2834_v50 = vor.u32 %v4092_v36, %v2831_v37  ;;  %v1686_v51 = vpop.f32.mrf.mxu3  ;;  %v4112_v17 = vld [vmem:[#allocation2 + $0x16c] sm:$0xf] }
  0xc5   :  { %v3090_v53 = vor.u32 %v4156_v45, %v3087_v46  ;;  %v4176_v30 = vld [vmem:[#allocation2 + $0x36c] sm:$0xf]  ;;  %v2767_v37 = vld [vmem:[#allocation2 + $0x58] sm:$0xf0] }
  0xc6   :  { %1914 = vmatpush.bf16.msrb.mxu1 %v3406_v48  ;;  %1927 = vmatpush.bf16.msrb.mxu2 %v3534_v49  ;;  %v3215_v48 = vld [vmem:[#allocation2 + $0x3d8] sm:$0xf0]  ;;  %v1673_v49 = vpop.f32.mrf.mxu2  ;;  %v4076_v36 = vld [vmem:[#allocation2 + $0x4c] sm:$0xf] }
  0xc7   :  { %1940 = vmatpush.bf16.msrb.mxu3 %v3662_v55  ;;  %v2815_v55 = vld [vmem:[#allocation2 + $0xb8] sm:$0xf0]  ;;  %v3218_v57 = vor.u32 %v4188_v47, %v3215_v48  ;;  %v4140_v45 = vld [vmem:[#allocation2 + $0x24c] sm:$0xf]  ;;  %v2770_v51 = vor.u32 %v4076_v36, %v2767_v37 }
  0xc8   :  { %1902 = vmatpush.bf16.msrb.mxu0 %v3262_v62  ;;  %v3199_v62 = vld [vmem:[#allocation2 + $0x3b8] sm:$0xf0]  ;;  %v2818_v63 = vor.u32 %v4088_v54, %v2815_v55  ;;  %v4172_v49 = vld [vmem:[#allocation2 + $0x34c] sm:$0xf]  ;;  %v2898_v54 = vor.u32 %v4108_v39, %v2895_v43 }
  0xc9   :  { %v3202_v5 = vor.u32 %v4184_v61, %v3199_v62  ;;  %v3023_v46 = vld [vmem:[#allocation2 + $0x258] sm:$0xf0]  ;;  %v4072_v56 = vld [vmem:[#allocation2 + $0x2c] sm:$0xf] }
  0xca   :  { %1915 = vmatpush.bf16.msrb.mxu1 %v3390_v1  ;;  %1928 = vmatpush.bf16.msrb.mxu2 %v3518_v2  ;;  %v3074_v1 = vor.u32 %v4152_v59, %v3071_v60  ;;  %v4084_v2 = vld [vmem:[#allocation2 + $0x8c] sm:$0xf]  ;;  %v3026_v55 = vor.u32 %v4140_v45, %v3023_v46  ;;  %v2879_v61 = vld [vmem:[#allocation2 + $0x138] sm:$0xf0] }
  0xcb   :  { %1941 = vmatpush.bf16.msrb.mxu3 %v3646_v7  ;;  %v4148_v7 = vld [vmem:[#allocation2 + $0x28c] sm:$0xf]  ;;  %v2802_v11 = vor.u32 %v4084_v2, %v2799_v3  ;;  %v2735_v4 = vld [vmem:[#allocation2 + $0x18] sm:$0xf0] }
  0xcc   :  { %1903 = vmatpush.bf16.msrb.mxu0 %v3246_v16  ;;  %v3058_v14 = vor.u32 %v4148_v7, %v3055_v8  ;;  %v2783_v16 = vld [vmem:[#allocation2 + $0x78] sm:$0xf0]  ;;  %v4104_v58 = vld [vmem:[#allocation2 + $0x12c] sm:$0xf] }
  0xcd   :  { %v4136_v62 = vld [vmem:[#allocation2 + $0x22c] sm:$0xf]  ;;  %v2863_v8 = vld [vmem:[#allocation2 + $0x118] sm:$0xf0] }
  0xce   :  { %1916 = vmatpush.bf16.msrb.mxu1 %v3374_v27  ;;  %1929 = vmatpush.bf16.msrb.mxu2 %v3502_v28  ;;  %v1697_v12 = vpop.f32.mrf.mxu0  ;;  %v2911_v27 = vld [vmem:[#allocation2 + $0x178] sm:$0xf0]  ;;  %v4144_v28 = vld [vmem:[#allocation2 + $0x26c] sm:$0xf] }
  0xcf   :  { %1942 = vmatpush.bf16.msrb.mxu3 %v3630_v32  ;;  %1904 = vmatmul.bf16.vlgmr.msrb.gmra.mxu0 %v4541_v41  ;;  %v1698_v21 = vadd.f32 %v1697_v12, %v4569_v24  ;;  %v3170_v24 = vor.u32 %v4176_v30, %v3167_v31  ;;  %v4068_v3 = vld [vmem:[#allocation2 + $0xc] sm:$0xf]  ;;  %v2991_v12 = vld [vmem:[#allocation2 + $0x218] sm:$0xf0] }
  0xd0   :  { %1948 = vmatpush.bf16.msra.mxu0 %v2850_v33  ;;  %v1710_v23 = vpop.f32.mrf.mxu1  ;;  %v2786_v33 = vor.u32 %v4080_v15, %v2783_v16  ;;  %v4100_v7 = vld [vmem:[#allocation2 + $0x10c] sm:$0xf]  ;;  %v3343_v39 = vld [vmem:[#allocation2 + $0x4d8] sm:$0xf0] }
  0xd1   :  { %1930 = vmatmul.bf16.vlgmr.msrb.gmra.mxu2 %v4539_v38  ;;  %1917 = vmatmul.bf16.vlgmr.msrb.gmra.mxu1 %v4545_v44  ;;  %v1711_v32 = vadd.f32 %v1710_v23, %v1698_v21  ;;  %v4132_v9 = vld [vmem:[#allocation2 + $0x20c] sm:$0xf]  ;;  %v2738_v23 = vor.u32 %v4068_v3, %v2735_v4  ;;  %v3471_v43 = vld [vmem:[#allocation2 + $0x5d8] sm:$0xf0] }
  0xd2   :  { %1961 = vmatpush.bf16.msra.mxu1 %v2978_v34  ;;  %1974 = vmatpush.bf16.msra.mxu2 %v3106_v35  ;;  %v2914_v34 = vor.u32 %v4112_v17, %v2911_v27  ;;  %v3042_v35 = vor.u32 %v4144_v28, %v3039_v29  ;;  %v4224_v16 = vld [vmem:[#allocation2 + $0x4ec] sm:$0xf]  ;;  %v3359_v17 = vld [vmem:[#allocation2 + $0x4f8] sm:$0xf0]  ;;  %v2866_v29 = vor.u32 %v4100_v7, %v2863_v8 }
  0xd3   :  { %1987 = vmatpush.bf16.msra.mxu3 %v3234_v40  ;;  %v4256_v21 = vld [vmem:[#allocation2 + $0x5ec] sm:$0xf]  ;;  %v3615_v28 = vld [vmem:[#allocation2 + $0x6f8] sm:$0xf0]  ;;  %v2994_v30 = vor.u32 %v4132_v9, %v2991_v12 }
  0xd4   :  { %1943 = vmatmul.bf16.vlgmr.msrb.gmra.mxu3 %v4543_v42  ;;  %1949 = vmatpush.bf16.msra.mxu0 %v2834_v50  ;;  %v1723_v40 = vpop.f32.mrf.mxu2  ;;  %v3151_v50 = vld [vmem:[#allocation2 + $0x358] sm:$0xf0]  ;;  %v4288_v27 = vld [vmem:[#allocation2 + $0x6ec] sm:$0xf] }
  0xd5   :  { %v1724_v47 = vadd.f32 %v1723_v40, %v1711_v32  ;;  %v3154_v60 = vor.u32 %v4172_v49, %v3151_v50  ;;  %v4320_v31 = vld [vmem:[#allocation2 + $0x7ec] sm:$0xf]  ;;  %v3743_v32 = vld [vmem:[#allocation2 + $0x7f8] sm:$0xf0]  ;;  %v3618_v36 = vor.u32 %v4288_v27, %v3615_v28 }
  0xd6   :  { %1962 = vmatpush.bf16.msra.mxu1 %v2962_v52  ;;  %1975 = vmatpush.bf16.msra.mxu2 %v3090_v53  ;;  %v1699_v53 = vpop.f32.mrf.mxu0  ;;  %v4220_v37 = vld [vmem:[#allocation2 + $0x4cc] sm:$0xf]  ;;  %v3599_v46 = vld [vmem:[#allocation2 + $0x6d8] sm:$0xf0] }
  0xd7   :  { %1988 = vmatpush.bf16.msra.mxu3 %v3218_v57  ;;  %v1736_v48 = vpop.f32.mrf.mxu3  ;;  %v2751_v57 = vld [vmem:[#allocation2 + $0x38] sm:$0xf0]  ;;  %v4252_v40 = vld [vmem:[#allocation2 + $0x5cc] sm:$0xf]  ;;  %v3346_v49 = vor.u32 %v4220_v37, %v3343_v39 }
  0xd8   :  { %1950 = vmatpush.bf16.msra.mxu0 %v2818_v63  ;;  %v4576_v52 = vadd.f32 %v1736_v48, %v1724_v47  ;;  %v1712_v59 = vpop.f32.mrf.mxu1  ;;  %v3007_v63 = vld [vmem:[#allocation2 + $0x238] sm:$0xf0]  ;;  %v2754_v2 = vor.u32 %v4072_v56, %v2751_v57  ;;  %v4284_v45 = vld [vmem:[#allocation2 + $0x6cc] sm:$0xf]  ;;  %v3474_v50 = vor.u32 %v4252_v40, %v3471_v43 }
  0xd9   :  { %v3010_v6 = vor.u32 %v4136_v62, %v3007_v63  ;;  %v4316_v47 = vld [vmem:[#allocation2 + $0x7cc] sm:$0xf]  ;;  %v3727_v48 = vld [vmem:[#allocation2 + $0x7d8] sm:$0xf0] }
  0xda   :  { %1963 = vmatpush.bf16.msra.mxu1 %v2946_v0  ;;  %1976 = vmatpush.bf16.msra.mxu2 %v3074_v1  ;;  %v4168_v0 = vld [vmem:[#allocation2 + $0x32c] sm:$0xf]  ;;  %v3135_v1 = vld [vmem:[#allocation2 + $0x338] sm:$0xf0]  ;;  %v3730_v56 = vor.u32 %v4316_v47, %v3727_v48 }
  0xdb   :  { %1989 = vmatpush.bf16.msra.mxu3 %v3202_v5  ;;  %v2882_v5 = vor.u32 %v4104_v58, %v2879_v61  ;;  %v4216_v53 = vld [vmem:[#allocation2 + $0x4ac] sm:$0xf]  ;;  %v3455_v57 = vld [vmem:[#allocation2 + $0x5b8] sm:$0xf0] }
  0xdc   :  { %1951 = vmatpush.bf16.msra.mxu0 %v2802_v11  ;;  %v1725_v10 = vpop.f32.mrf.mxu2  ;;  %v3138_v11 = vor.u32 %v4168_v0, %v3135_v1  ;;  %v4280_v58 = vld [vmem:[#allocation2 + $0x6ac] sm:$0xf]  ;;  %v3583_v59 = vld [vmem:[#allocation2 + $0x6b8] sm:$0xf0] }
  0xdd   :  { %v3711_v61 = vld [vmem:[#allocation2 + $0x7b8] sm:$0xf0]  ;;  %v3586_v0 = vor.u32 %v4280_v58, %v3583_v59  ;;  %v4212_v1 = vld [vmem:[#allocation2 + $0x48c] sm:$0xf]  ;;  %v321_v58 = vperm.slane %v4566_v26, 1 }
  0xde   :  { %1964 = vmatpush.bf16.msra.mxu1 %v2930_v13  ;;  %1977 = vmatpush.bf16.msra.mxu2 %v3058_v14  ;;  %v4164_v13 = vld [vmem:[#allocation2 + $0x30c] sm:$0xf]  ;;  %v3119_v14 = vld [vmem:[#allocation2 + $0x318] sm:$0xf0]  ;;  %v4338_v26 = vld [vmem:[#allocation4 + $0x74] sm:$0xf0] }
  0xdf   :  { %1990 = vmatpush.bf16.msra.mxu3 %v3186_v25  ;;  %v1738_v15 = vpop.f32.mrf.mxu3  ;;  %v3487_v25 = vld [vmem:[#allocation2 + $0x5f8] sm:$0xf0]  ;;  %v4308_v7 = vld [vmem:[#allocation2 + $0x78c] sm:$0xf] }
  0xe0   :  { %1952 = vmatpush.bf16.msra.mxu0 %v2786_v33  ;;  %v3122_v33 = vor.u32 %v4164_v13, %v3119_v14  ;;  %v3439_v4 = vld [vmem:[#allocation2 + $0x598] sm:$0xf0]  ;;  %v4208_v10 = vld [vmem:[#allocation2 + $0x46c] sm:$0xf] }
  0xe1   :  { %v4240_v12 = vld [vmem:[#allocation2 + $0x56c] sm:$0xf]  ;;  %v3423_v15 = vld [vmem:[#allocation2 + $0x578] sm:$0xf0] }
  0xe2   :  { %1965 = vmatpush.bf16.msra.mxu1 %v2914_v34  ;;  %1978 = vmatpush.bf16.msra.mxu2 %v3042_v35  ;;  %v3362_v34 = vor.u32 %v4224_v16, %v3359_v17  ;;  %v3490_v35 = vor.u32 %v4256_v21, %v3487_v25  ;;  %v4272_v16 = vld [vmem:[#allocation2 + $0x66c] sm:$0xf]  ;;  %v3551_v17 = vld [vmem:[#allocation2 + $0x678] sm:$0xf0]  ;;  %v3426_v27 = vor.u32 %v4240_v12, %v3423_v15 }
  0xe3   :  { %1991 = vmatpush.bf16.msra.mxu3 %v3170_v24  ;;  %v3746_v24 = vor.u32 %v4320_v31, %v3743_v32  ;;  %v4304_v21 = vld [vmem:[#allocation2 + $0x76c] sm:$0xf]  ;;  %v3554_v28 = vor.u32 %v4272_v16, %v3551_v17  ;;  %v3663_v40 = vld [vmem:[#allocation2 + $0x758] sm:$0xf0] }
  0xe4   :  { %1953 = vmatpush.bf16.msra.mxu0 %v2770_v51  ;;  %v3602_v51 = vor.u32 %v4284_v45, %v3599_v46  ;;  %v4236_v31 = vld [vmem:[#allocation2 + $0x54c] sm:$0xf]  ;;  %v3263_v48 = vld [vmem:[#allocation2 + $0x438] sm:$0xf0] }
  0xe5   :  { %v4300_v39 = vld [vmem:[#allocation2 + $0x74c] sm:$0xf] }
  0xe6   :  { %1966 = vmatpush.bf16.msra.mxu1 %v2898_v54  ;;  %1979 = vmatpush.bf16.msra.mxu2 %v3026_v55  ;;  %v3327_v54 = vld [vmem:[#allocation2 + $0x4b8] sm:$0xf0]  ;;  %v4248_v55 = vld [vmem:[#allocation2 + $0x5ac] sm:$0xf] }
  0xe7   :  { %1992 = vmatpush.bf16.msra.mxu3 %v3154_v60  ;;  %v4312_v60 = vld [vmem:[#allocation2 + $0x7ac] sm:$0xf]  ;;  %v3330_v62 = vor.u32 %v4216_v53, %v3327_v54  ;;  %v3458_v63 = vor.u32 %v4248_v55, %v3455_v57  ;;  %v3391_v53 = vld [vmem:[#allocation2 + $0x538] sm:$0xf0] }
  0xe8   :  { %1954 = vmatpush.bf16.msra.mxu0 %v2754_v2  ;;  %v3311_v2 = vld [vmem:[#allocation2 + $0x498] sm:$0xf0]  ;;  %v3714_v3 = vor.u32 %v4312_v60, %v3711_v61  ;;  %v4200_v47 = vld [vmem:[#allocation2 + $0x42c] sm:$0xf] }
  0xe9   :  { %v4264_v54 = vld [vmem:[#allocation2 + $0x62c] sm:$0xf]  ;;  %v3519_v55 = vld [vmem:[#allocation2 + $0x638] sm:$0xf0]  ;;  %v3266_v59 = vor.u32 %v4200_v47, %v3263_v48  ;;  %v3773_v47 = vld [vmem:[#allocation4 + $0x30] sm:$0xf] }
  0xea   :  { %1967 = vmatpush.bf16.msra.mxu1 %v2882_v5  ;;  %1980 = vmatpush.bf16.msra.mxu2 %v3010_v6  ;;  %v4276_v5 = vld [vmem:[#allocation2 + $0x68c] sm:$0xf]  ;;  %v3567_v6 = vld [vmem:[#allocation2 + $0x698] sm:$0xf0]  ;;  %v3837_v48 = vld [vmem:[#allocation4 + $0xb0] sm:$0xf] }
  0xeb   :  { %1993 = vmatpush.bf16.msra.mxu3 %v3138_v11  ;;  %v3570_v9 = vor.u32 %v4276_v5, %v3567_v6  ;;  %v3295_v11 = vld [vmem:[#allocation2 + $0x478] sm:$0xf0]  ;;  %v4196_v60 = vld [vmem:[#allocation2 + $0x40c] sm:$0xf] }
  0xec   :  { %1955 = vmatpush.bf16.msra.mxu0 %v2738_v23  ;;  %v4582_v8 = vpop.f32.mrf.mxu0  ;;  %v3679_v23 = vld [vmem:[#allocation2 + $0x778] sm:$0xf0]  ;;  %v3298_v25 = vor.u32 %v4208_v10, %v3295_v11  ;;  %v4292_v5 = vld [vmem:[#allocation2 + $0x70c] sm:$0xf]  ;;  %v4354_v10 = vld [vmem:[#allocation4 + $0xf4] sm:$0xf0] }
  0xed   :  { %v3647_v57 = vld [vmem:[#allocation2 + $0x738] sm:$0xf0] }
  0xee   :  { %1968 = vmatpush.bf16.msra.mxu1 %v2866_v29  ;;  %1981 = vmatpush.bf16.msra.mxu2 %v2994_v30  ;;  %v4584_v13 = vpop.f32.mrf.mxu1  ;;  %v4204_v29 = vld [vmem:[#allocation2 + $0x44c] sm:$0xf]  ;;  %v3279_v30 = vld [vmem:[#allocation2 + $0x458] sm:$0xf0] }
  0xef   :  { %1994 = vmatpush.bf16.msra.mxu3 %v3122_v33  ;;  %1956 = vmatmul.bf16.vlgmr.msra.gmra.mxu0 %v4523_v19  ;;  %v3695_v19 = vld [vmem:[#allocation2 + $0x798] sm:$0xf0]  ;;  %v3682_v33 = vor.u32 %v4304_v21, %v3679_v23  ;;  %v3797_v21 = vld [vmem:[#allocation4 + $0x60] sm:$0xf]  ;;  %v4336_v23 = vld [vmem:[#allocation4 + $0x64] sm:$0xf0] }
  0xf0   :  { %2000 = vmatpush.bf16.msrb.mxu0 %v3362_v34  ;;  %v3698_v14 = vor.u32 %v4308_v7, %v3695_v19  ;;  %v3407_v34 = vld [vmem:[#allocation2 + $0x558] sm:$0xf0]  ;;  %v3805_v19 = vld [vmem:[#allocation4 + $0x70] sm:$0xf] }
  0xf1   :  { %1982 = vmatmul.bf16.vlgmr.msra.gmra.mxu2 %v4521_v18  ;;  %1969 = vmatmul.bf16.vlgmr.msra.gmra.mxu1 %v4527_v22  ;;  %v4244_v18 = vld [vmem:[#allocation2 + $0x58c] sm:$0xf]  ;;  %v3410_v45 = vor.u32 %v4236_v31, %v3407_v34  ;;  %v3631_v7 = vld [vmem:[#allocation2 + $0x718] sm:$0xf0]  ;;  %v3806_v15 = vor.u32 %v4338_v26, %v3805_v19  ;;  %v4334_v31 = vld [vmem:[#allocation4 + $0x54] sm:$0xf0] }
  0xf2   :  { %2013 = vmatpush.bf16.msrb.mxu1 %v3490_v35  ;;  %2026 = vmatpush.bf16.msrb.mxu2 %v3618_v36  ;;  %v3442_v22 = vor.u32 %v4244_v18, %v3439_v4  ;;  %v4268_v35 = vld [vmem:[#allocation2 + $0x64c] sm:$0xf]  ;;  %v3535_v36 = vld [vmem:[#allocation2 + $0x658] sm:$0xf0]  ;;  %v3821_v19 = vld [vmem:[#allocation4 + $0x90] sm:$0xf] }
  0xf3   :  { %2039 = vmatpush.bf16.msrb.mxu3 %v3746_v24  ;;  %v3282_v24 = vor.u32 %v4204_v29, %v3279_v30  ;;  %v3538_v46 = vor.u32 %v4268_v35, %v3535_v36  ;;  %v3503_v4 = vld [vmem:[#allocation2 + $0x618] sm:$0xf0]  ;;  %v3789_v30 = vld [vmem:[#allocation4 + $0x50] sm:$0xf] }
  0xf4   :  { %1995 = vmatmul.bf16.vlgmr.msra.gmra.mxu3 %v4525_v20  ;;  %2001 = vmatpush.bf16.msrb.mxu0 %v3346_v49  ;;  %v3314_v20 = vor.u32 %v4212_v1, %v3311_v2  ;;  %v4586_v32 = vpop.f32.mrf.mxu2  ;;  %v1751_v43 = vpop.f32.mrf.mxu0  ;;  %v4232_v49 = vld [vmem:[#allocation2 + $0x52c] sm:$0xf]  ;;  %v3375_v1 = vld [vmem:[#allocation2 + $0x518] sm:$0xf0]  ;;  %v3790_v34 = vor.u32 %v4334_v31, %v3789_v30  ;;  %v4353_v30 = vld [vmem:[#allocation4 + $0xf4] sm:$0xf] }
  0xf5   :  { %v3394_v61 = vor.u32 %v4232_v49, %v3391_v53  ;;  %v4370_v43 = vld [vmem:[#allocation4 + $0x174] sm:$0xf0]  ;;  %v4368_v53 = vld [vmem:[#allocation4 + $0x164] sm:$0xf0]  ;;  %v3871_v31 = vld [vmem:[#allocation4 + $0xf8] sm:$0xf0] }
  0xf6   :  { %2014 = vmatpush.bf16.msrb.mxu1 %v3474_v50  ;;  %2027 = vmatpush.bf16.msrb.mxu2 %v3602_v51  ;;  %v1764_v50 = vpop.f32.mrf.mxu1  ;;  %v3666_v51 = vor.u32 %v4300_v39, %v3663_v40  ;;  %v4332_v39 = vld [vmem:[#allocation4 + $0x44] sm:$0xf0]  ;;  %v3845_v40 = vld [vmem:[#allocation4 + $0xc0] sm:$0xf] }
  0xf7   :  { %2040 = vmatpush.bf16.msrb.mxu3 %v3730_v56  ;;  %v4588_v37 = vpop.f32.mrf.mxu3  ;;  %v4296_v56 = vld [vmem:[#allocation2 + $0x72c] sm:$0xf] }
  0xf8   :  { %2002 = vmatpush.bf16.msrb.mxu0 %v3330_v62  ;;  %v3522_v62 = vor.u32 %v4264_v54, %v3519_v55  ;;  %v3650_v18 = vor.u32 %v4296_v56, %v3647_v57 }
  0xfa   :  { %2015 = vmatpush.bf16.msrb.mxu1 %v3458_v63  ;;  %2028 = vmatpush.bf16.msrb.mxu2 %v3586_v0  ;;  %v3247_v63 = vld [vmem:[#allocation2 + $0x418] sm:$0xf0]  ;;  %v4228_v0 = vld [vmem:[#allocation2 + $0x50c] sm:$0xf] }
  0xfb   :  { %2041 = vmatpush.bf16.msrb.mxu3 %v3714_v3  ;;  %v4260_v3 = vld [vmem:[#allocation2 + $0x60c] sm:$0xf]  ;;  %v3378_v11 = vor.u32 %v4228_v0, %v3375_v1  ;;  %v3917_v0 = vld [vmem:[#allocation4 + $0x150] sm:$0xf]  ;;  %v4366_v1 = vld [vmem:[#allocation4 + $0x154] sm:$0xf0] }
  0xfc   :  { %2003 = vmatpush.bf16.msrb.mxu0 %v3314_v20  ;;  %v1777_v2 = vpop.f32.mrf.mxu2  ;;  %v1750_v20 = vadd.f32 %v4582_v8, %v321_v58  ;;  %v3506_v12 = vor.u32 %v4260_v3, %v3503_v4  ;;  %v3798_v8 = vor.u32 %v4336_v23, %v3797_v21  ;;  %v3765_v58 = vld [vmem:[#allocation4 + $0x20] sm:$0xf]  ;;  %v4340_v21 = vld [vmem:[#allocation4 + $0x84] sm:$0xf0]  ;;  %v4337_v23 = vld [vmem:[#allocation4 + $0x74] sm:$0xf] }
  0xfd   :  { %v3918_v2 = vor.u32 %v4366_v1, %v3917_v0  ;;  %v4347_v0 = vld [vmem:[#allocation4 + $0xc4] sm:$0xf]  ;;  %v3847_v1 = vld [vmem:[#allocation4 + $0xc8] sm:$0xf0] }
  0xfe   :  { %2016 = vmatpush.bf16.msrb.mxu1 %v3442_v22  ;;  %2029 = vmatpush.bf16.msrb.mxu2 %v3570_v9  ;;  %v3250_v22 = vor.u32 %v4196_v60, %v3247_v63  ;;  %v3869_v9 = vld [vmem:[#allocation4 + $0xf0] sm:$0xf]  ;;  %v1763_v17 = vadd.f32 %v4584_v13, %v1750_v20  ;;  %v3829_v60 = vld [vmem:[#allocation4 + $0xa0] sm:$0xf]  ;;  %v4342_v20 = vld [vmem:[#allocation4 + $0x94] sm:$0xf0] }
  0xff   :  { %2042 = vmatpush.bf16.msrb.mxu3 %v3698_v14  ;;  %v1790_v6 = vpop.f32.mrf.mxu3  ;;  %v3634_v14 = vor.u32 %v4292_v5, %v3631_v7  ;;  %v3870_v16 = vor.u32 %v4354_v10, %v3869_v9  ;;  %v3853_v13 = vld [vmem:[#allocation4 + $0xd0] sm:$0xf]  ;;  %v4326_v7 = vld [vmem:[#allocation4 + $0x14] sm:$0xf0]  ;;  %v4364_v9 = vld [vmem:[#allocation4 + $0x144] sm:$0xf0] }
 0x100   :  { %2004 = vmatpush.bf16.msrb.mxu0 %v3298_v25  ;;  %v3861_v25 = vld [vmem:[#allocation4 + $0xe0] sm:$0xf]  ;;  %v1776_v29 = vadd.f32 %v4586_v32, %v1763_v17  ;;  %v4348_v32 = vld [vmem:[#allocation4 + $0xc4] sm:$0xf0]  ;;  %v3757_v6 = vld [vmem:[#allocation4 + $0x10] sm:$0xf] }
 0x101   :  { %v3813_v17 = vld [vmem:[#allocation4 + $0x80] sm:$0xf] }
 0x102   :  { %2017 = vmatpush.bf16.msrb.mxu1 %v3426_v27  ;;  %2030 = vmatpush.bf16.msrb.mxu2 %v3554_v28  ;;  %v4352_v27 = vld [vmem:[#allocation4 + $0xe4] sm:$0xf0]  ;;  %v1789_v35 = vadd.f32 %v4588_v37, %v1776_v29  ;;  %v4346_v37 = vld [vmem:[#allocation4 + $0xb4] sm:$0xf0] }
 0x103   :  { %2043 = vmatpush.bf16.msrb.mxu3 %v3682_v33  ;;  %v3862_v28 = vor.u32 %v4352_v27, %v3861_v25  ;;  %v4350_v33 = vld [vmem:[#allocation4 + $0xd4] sm:$0xf0]  ;;  %v3838_v57 = vor.u32 %v4346_v37, %v3837_v48  ;;  %v3807_v27 = vld [vmem:[#allocation4 + $0x78] sm:$0xf0] }
 0x104   :  { %2005 = vmatpush.bf16.msrb.mxu0 %v3282_v24  ;;  %v3854_v36 = vor.u32 %v4350_v33, %v3853_v13  ;;  %v3933_v24 = vld [vmem:[#allocation4 + $0x170] sm:$0xf]  ;;  %v4362_v29 = vld [vmem:[#allocation4 + $0x134] sm:$0xf0]  ;;  %v3791_v37 = vld [vmem:[#allocation4 + $0x58] sm:$0xf0] }
 0x105   :  { %v4358_v48 = vld [vmem:[#allocation4 + $0x114] sm:$0xf0] }
 0x106   :  { %2018 = vmatpush.bf16.msrb.mxu1 %v3410_v45  ;;  %2031 = vmatpush.bf16.msrb.mxu2 %v3538_v46  ;;  %v3934_v45 = vor.u32 %v4370_v43, %v3933_v24  ;;  %v3846_v46 = vor.u32 %v4348_v32, %v3845_v40  ;;  %v3874_v40 = vor.u32 %v4353_v30, %v3871_v31  ;;  %v3799_v32 = vld [vmem:[#allocation4 + $0x68] sm:$0xf0]  ;;  %v3893_v24 = vld [vmem:[#allocation4 + $0x120] sm:$0xf]  ;;  %v4360_v43 = vld [vmem:[#allocation4 + $0x124] sm:$0xf0] }
 0x107   :  { %2044 = vmatpush.bf16.msrb.mxu3 %v3666_v51  ;;  %v3925_v51 = vld [vmem:[#allocation4 + $0x160] sm:$0xf]  ;;  %v3759_v30 = vld [vmem:[#allocation4 + $0x18] sm:$0xf0]  ;;  %v4341_v31 = vld [vmem:[#allocation4 + $0x94] sm:$0xf] }
 0x108   :  { %2006 = vmatpush.bf16.msrb.mxu0 %v3266_v59  ;;  %v3926_v54 = vor.u32 %v4368_v53, %v3925_v51  ;;  %v4328_v59 = vld [vmem:[#allocation4 + $0x24] sm:$0xf0]  ;;  %v4349_v51 = vld [vmem:[#allocation4 + $0xd4] sm:$0xf] }
 0x10a   :  { %2019 = vmatpush.bf16.msrb.mxu1 %v3394_v61  ;;  %2032 = vmatpush.bf16.msrb.mxu2 %v3522_v62  ;;  %v4344_v62 = vld [vmem:[#allocation4 + $0xa4] sm:$0xf0] }
 0x10b   :  { %2045 = vmatpush.bf16.msrb.mxu3 %v3650_v18  ;;  %v3766_v18 = vor.u32 %v4328_v59, %v3765_v58  ;;  %v3830_v5 = vor.u32 %v4344_v62, %v3829_v60  ;;  %v3935_v58 = vld [vmem:[#allocation4 + $0x178] sm:$0xf0]  ;;  %v3783_v62 = vld [vmem:[#allocation4 + $0x48] sm:$0xf0] }
 0x10c   :  { %2007 = vmatpush.bf16.msrb.mxu0 %v3250_v22  ;;  %v3909_v22 = vld [vmem:[#allocation4 + $0x140] sm:$0xf] }
 0x10d   :  { %v3910_v10 = vor.u32 %v4364_v9, %v3909_v22  ;;  %v3927_v22 = vld [vmem:[#allocation4 + $0x168] sm:$0xf0] }
 0x10e   :  { %2020 = vmatpush.bf16.msrb.mxu1 %v3378_v11  ;;  %2033 = vmatpush.bf16.msrb.mxu2 %v3506_v12  ;;  %v1814_v50 = vpop.f32.mrf.mxu1  ;;  %v3758_v12 = vor.u32 %v4326_v7, %v3757_v6  ;;  %v4345_v6 = vld [vmem:[#allocation4 + $0xb4] sm:$0xf] }
 0x10f   :  { %2046 = vmatpush.bf16.msrb.mxu3 %v3634_v14  ;;  %2008 = vmatmul.bf16.vlgmr.msrb.gmra.mxu0 %v4541_v41  ;;  %v3781_v41 = vld [vmem:[#allocation4 + $0x40] sm:$0xf] }
 0x110   :  { %2450 = vmatpush.bf16.msra.mxu0 %v3806_v15  ;;  %v3749_v14 = vld [vmem:[#allocation4] sm:$0xf]  ;;  %v4324_v15 = vld [vmem:[#allocation4 + $0x4] sm:$0xf0] }
 0x111   :  { %2021 = vmatmul.bf16.vlgmr.msrb.gmra.mxu1 %v4545_v44  ;;  %2034 = vmatmul.bf16.vlgmr.msrb.gmra.mxu2 %v4539_v38  ;;  %v3782_v44 = vor.u32 %v4332_v39, %v3781_v41  ;;  %v1801_v38 = vpop.f32.mrf.mxu0  ;;  %v3810_v41 = vor.u32 %v4337_v23, %v3807_v27  ;;  %v4335_v39 = vld [vmem:[#allocation4 + $0x64] sm:$0xf]  ;;  %v3919_v23 = vld [vmem:[#allocation4 + $0x158] sm:$0xf0] }
 0x112   :  { %2463 = vmatpush.bf16.msra.mxu1 %v3870_v16  ;;  %2047 = vmatmul.bf16.vlgmr.msrb.gmra.mxu3 %v4543_v42  ;;  %v4330_v42 = vld [vmem:[#allocation4 + $0x34] sm:$0xf0]  ;;  %v1802_v49 = vadd.f32 %v1801_v38, %v1789_v35  ;;  %v3822_v16 = vor.u32 %v4342_v20, %v3821_v19  ;;  %v2052_v35 = vmax.f32 %v4576_v52, 0.0  ;;  %v3894_v38 = vor.u32 %v4360_v43, %v3893_v24  ;;  %v3839_v19 = vld [vmem:[#allocation4 + $0xb8] sm:$0xf0] }
 0x113   :  { %2476 = vmatpush.bf16.msra.mxu2 %v3934_v45  ;;  %v3774_v55 = vor.u32 %v4330_v42, %v3773_v47  ;;  %v4351_v45 = vld [vmem:[#allocation4 + $0xe4] sm:$0xf]  ;;  %v3802_v52 = vor.u32 %v4335_v39, %v3799_v32  ;;  %v3885_v42 = vld [vmem:[#allocation4 + $0x110] sm:$0xf] }
 0x114   :  { %2451 = vmatpush.bf16.msra.mxu0 %v3798_v8  ;;  %v1815_v56 = vadd.f32 %v1814_v50, %v1802_v49  ;;  %v1827_v61 = vpop.f32.mrf.mxu2  ;;  %v4602_v47 = vpack.c.bf16 %v2052_v35, %v2052_v35  ;;  %v4333_v50 = vld [vmem:[#allocation4 + $0x54] sm:$0xf]  ;;  %v3886_v53 = vor.u32 %v4358_v48, %v3885_v42  ;;  %v4367_v20 = vld [vmem:[#allocation4 + $0x164] sm:$0xf]  ;;  %v3815_v42 = vld [vmem:[#allocation4 + $0x88] sm:$0xf0] }
 0x115   :  { %v3794_v59 = vor.u32 %v4333_v50, %v3791_v37  ;;  %v3930_v9 = vor.u32 %v4367_v20, %v3927_v22  ;;  %v4363_v35 = vld [vmem:[#allocation4 + $0x144] sm:$0xf] }
 0x116   :  { %2464 = vmatpush.bf16.msra.mxu1 %v3862_v28  ;;  %v1828_v3 = vadd.f32 %v1827_v61, %v1815_v56  ;;  %v1816_v26 = vpop.f32.mrf.mxu1  ;;  %v3901_v28 = vld [vmem:[#allocation4 + $0x130] sm:$0xf]  ;;  %v4356_v56 = vld [vmem:[#allocation4 + $0x104] sm:$0xf0]  ;;  %v4331_v61 = vld [vmem:[#allocation4 + $0x44] sm:$0xf] }
 0x117   :  { %2477 = vmatpush.bf16.msra.mxu2 %v3926_v54  ;;  %v1840_v63 = vpop.f32.mrf.mxu3  ;;  %v3902_v13 = vor.u32 %v4362_v29, %v3901_v28  ;;  %v3855_v54 = vld [vmem:[#allocation4 + $0xd8] sm:$0xf0]  ;;  %v4325_v29 = vld [vmem:[#allocation4 + $0x14] sm:$0xf]  ;;  %v4323_v24 = vld [vmem:[#allocation4 + $0x4] sm:$0xf] }
 0x118   :  { %2452 = vmatpush.bf16.msra.mxu0 %v3790_v34  ;;  %v1841_v11 = vadd.f32 %v1840_v63, %v1828_v3  ;;  %v3750_v34 = vor.u32 %v4324_v15, %v3749_v14  ;;  %v3858_v60 = vor.u32 %v4349_v51, %v3855_v54  ;;  %v3850_v3 = vor.u32 %v4347_v0, %v3847_v1  ;;  %v3767_v14 = vld [vmem:[#allocation4 + $0x28] sm:$0xf0]  ;;  %v4343_v15 = vld [vmem:[#allocation4 + $0xa4] sm:$0xf] }
 0x119   :  { %v1803_v4 = vpop.f32.mrf.mxu0  ;;  %v3762_v39 = vor.u32 %v4325_v29, %v3759_v30  ;;  %v4359_v37 = vld [vmem:[#allocation4 + $0x124] sm:$0xf]  ;;  %v3895_v51 = vld [vmem:[#allocation4 + $0x128] sm:$0xf0]  ;;  %v4376_v29 = vld [vmem:[#allocation4 + $0x1a4] sm:$0xf0] }
 0x11a   :  { %2465 = vmatpush.bf16.msra.mxu1 %v3854_v36  ;;  %v2053_v33 = vmax.f32 %v1841_v11, 0.0  ;;  %v3814_v36 = vor.u32 %v4340_v21, %v3813_v17  ;;  %v4329_v4 = vld [vmem:[#allocation4 + $0x34] sm:$0xf]  ;;  %v3842_v11 = vor.u32 %v4345_v6, %v3839_v19  ;;  %v4355_v0 = vld [vmem:[#allocation4 + $0x104] sm:$0xf] }
 0x11b   :  { %2478 = vmatpush.bf16.msra.mxu2 %v3918_v2  ;;  %v4365_v21 = vld [vmem:[#allocation4 + $0x154] sm:$0xf]  ;;  %v3879_v1 = vld [vmem:[#allocation4 + $0x108] sm:$0xf0]  ;;  %v4382_v19 = vld [vmem:[#allocation4 + $0x1d4] sm:$0xf0] }
 0x11c   :  { %2453 = vmatpush.bf16.msra.mxu0 %v3782_v44  ;;  %v1829_v25 = vpop.f32.mrf.mxu2  ;;  %v3863_v44 = vld [vmem:[#allocation4 + $0xe8] sm:$0xf0]  ;;  %v3922_v27 = vor.u32 %v4365_v21, %v3919_v23 }
 0x11d   :  { %v3866_v49 = vor.u32 %v4351_v45, %v3863_v44  ;;  %v3751_v45 = vld [vmem:[#allocation4 + $0x8] sm:$0xf0]  ;;  %v4361_v44 = vld [vmem:[#allocation4 + $0x134] sm:$0xf] }
 0x11e   :  { %2466 = vmatpush.bf16.msra.mxu1 %v3846_v46  ;;  %v4600_v46 = vpack.c.bf16 %v2053_v33, %v2053_v33  ;;  %v3823_v33 = vld [vmem:[#allocation4 + $0x98] sm:$0xf0] }
 0x11f   :  { %2479 = vmatpush.bf16.msra.mxu2 %v3910_v10  ;;  %v1842_v8 = vpop.f32.mrf.mxu3  ;;  %v3826_v43 = vor.u32 %v4341_v31, %v3823_v33 }
 0x120   :  { %2454 = vmatpush.bf16.msra.mxu0 %v3774_v55  ;;  %v3877_v55 = vld [vmem:[#allocation4 + $0x100] sm:$0xf] }
 0x121   :  { %v3878_v63 = vor.u32 %v4356_v56, %v3877_v55  ;;  %v3754_v55 = vor.u32 %v4323_v24, %v3751_v45  ;;  %v4386_v56 = vld [vmem:[#allocation4 + $0x1f4] sm:$0xf0]  ;;  %v4385_v24 = vld [vmem:[#allocation4 + $0x1f4] sm:$0xf] }
 0x122   :  { %2467 = vmatpush.bf16.msra.mxu1 %v3838_v57  ;;  %v4369_v57 = vld [vmem:[#allocation4 + $0x174] sm:$0xf] }
 0x123   :  { %2480 = vmatpush.bf16.msra.mxu2 %v3902_v13  ;;  %v3938_v2 = vor.u32 %v4369_v57, %v3935_v58 }
 0x124   :  { %2455 = vmatpush.bf16.msra.mxu0 %v3766_v18  ;;  %v3786_v18 = vor.u32 %v4331_v61, %v3783_v62  ;;  %v3887_v61 = vld [vmem:[#allocation4 + $0x118] sm:$0xf0] }
 0x126   :  { %2468 = vmatpush.bf16.msra.mxu1 %v3830_v5  ;;  %v3775_v5 = vld [vmem:[#allocation4 + $0x38] sm:$0xf0] }
 0x127   :  { %2481 = vmatpush.bf16.msra.mxu2 %v3894_v38  ;;  %v3778_v10 = vor.u32 %v4329_v4, %v3775_v5  ;;  %v3903_v38 = vld [vmem:[#allocation4 + $0x138] sm:$0xf0]  ;;  %v3989_v4 = vld [vmem:[#allocation4 + $0x1e0] sm:$0xf]  ;;  %v4384_v5 = vld [vmem:[#allocation4 + $0x1e4] sm:$0xf0] }
 0x128   :  { %2456 = vmatpush.bf16.msra.mxu0 %v3758_v12  ;;  %v4327_v12 = vld [vmem:[#allocation4 + $0x24] sm:$0xf]  ;;  %v3990_v6 = vor.u32 %v4384_v5, %v3989_v4  ;;  %v3951_v4 = vld [vmem:[#allocation4 + $0x198] sm:$0xf0] }
 0x129   :  { %v3770_v8 = vor.u32 %v4327_v12, %v3767_v14 }
 0x12a   :  { %2469 = vmatpush.bf16.msra.mxu1 %v3822_v16  ;;  %v3831_v16 = vld [vmem:[#allocation4 + $0xa8] sm:$0xf0] }
 0x12b   :  { %2482 = vmatpush.bf16.msra.mxu2 %v3886_v53  ;;  %v3834_v28 = vor.u32 %v4343_v15, %v3831_v16  ;;  %v3997_v53 = vld [vmem:[#allocation4 + $0x1f0] sm:$0xf] }
 0x12c   :  { %2457 = vmatpush.bf16.msra.mxu0 %v3750_v34  ;;  %v1853_v7 = vpop.f32.mrf.mxu0  ;;  %v3998_v58 = vor.u32 %v4386_v56, %v3997_v53  ;;  %v3965_v16 = vld [vmem:[#allocation4 + $0x1b0] sm:$0xf] }
 0x12e   :  { %2470 = vmatpush.bf16.msra.mxu1 %v3814_v36  ;;  %v4606_v26 = vpop.f32.mrf.mxu1  ;;  %v3911_v36 = vld [vmem:[#allocation4 + $0x148] sm:$0xf0]  ;;  %2489 = vmatpush.bf16.msra.mxu3 %v3998_v58 }
 0x12f   :  { %2458 = vmatmul.bf16.vlgmr.msra.gmra.mxu0 %v4602_v47  ;;  %2483 = vmatpush.bf16.msra.mxu2 %v3878_v63 }
 0x130   :  { %2502 = vmatpush.bf16.msrb.mxu0 %v3810_v41  ;;  %v3914_v41 = vor.u32 %v4363_v35, %v3911_v36  ;;  %v4374_v35 = vld [vmem:[#allocation4 + $0x194] sm:$0xf0] }
 0x131   :  { %2471 = vmatmul.bf16.vlgmr.msra.gmra.mxu1 %v4600_v46 }
 0x132   :  { %2515 = vmatpush.bf16.msrb.mxu1 %v3874_v40  ;;  %v4611_v40 = vld [vmem:[%s4677_s2] sm:$0xf]  ;;  %2490 = vmatpush.bf16.msra.mxu3 %v3990_v6 }
 0x133   :  { %2528 = vmatpush.bf16.msrb.mxu2 %v3938_v2  ;;  %v322_v32 = vperm.slane %v4611_v40, 2 }
 0x134   :  { %2503 = vmatpush.bf16.msrb.mxu0 %v3802_v52  ;;  %v1879_v17 = vpop.f32.mrf.mxu2  ;;  %v1855_v13 = vpop.f32.mrf.mxu0  ;;  %v4339_v52 = vld [vmem:[#allocation4 + $0x84] sm:$0xf] }
 0x135   :  { %v1854_v54 = vadd.f32 %v1853_v7, %v322_v32  ;;  %v3818_v57 = vor.u32 %v4339_v52, %v3815_v42  ;;  %v3981_v7 = vld [vmem:[#allocation4 + $0x1d0] sm:$0xf] }
 0x136   :  { %2516 = vmatpush.bf16.msrb.mxu1 %v3866_v49  ;;  %v1868_v34 = vpop.f32.mrf.mxu1  ;;  %v3906_v49 = vor.u32 %v4361_v44, %v3903_v38  ;;  %v4383_v44 = vld [vmem:[#allocation4 + $0x1e4] sm:$0xf]  ;;  %v3991_v38 = vld [vmem:[#allocation4 + $0x1e8] sm:$0xf0] }
 0x137   :  { %2529 = vmatpush.bf16.msrb.mxu2 %v3930_v9  ;;  %v1892_v25 = vpop.f32.mrf.mxu3  ;;  %v1867_v62 = vadd.f32 %v4606_v26, %v1854_v54  ;;  %v3982_v9 = vor.u32 %v4382_v19, %v3981_v7  ;;  %v3949_v34 = vld [vmem:[#allocation4 + $0x190] sm:$0xf]  ;;  %v3994_v42 = vor.u32 %v4383_v44, %v3991_v38  ;;  %v4379_v54 = vld [vmem:[#allocation4 + $0x1c4] sm:$0xf]  ;;  %v3943_v19 = vld [vmem:[#allocation4 + $0x188] sm:$0xf0] }
 0x138   :  { %2504 = vmatpush.bf16.msrb.mxu0 %v3794_v59  ;;  %v3898_v59 = vor.u32 %v4359_v37, %v3895_v51  ;;  %v3950_v36 = vor.u32 %v4374_v35, %v3949_v34  ;;  %v4371_v7 = vld [vmem:[#allocation4 + $0x184] sm:$0xf]  ;;  %v4402_v44 = vld [vmem:[%s4680_s5 + $0x78] sm:$0xff]  ;;  %v4393_v38 = vld [vmem:[%s4680_s5 + $0x30] sm:$0xff] }
 0x139   :  { %v1880_v2 = vadd.f32 %v1879_v17, %v1867_v62  ;;  %2491 = vmatpush.bf16.msra.mxu3 %v3982_v9  ;;  %v4378_v17 = vld [vmem:[#allocation4 + $0x1b4] sm:$0xf0] }
 0x13a   :  { %2517 = vmatpush.bf16.msrb.mxu1 %v3858_v60  ;;  %v4357_v60 = vld [vmem:[#allocation4 + $0x114] sm:$0xf] }
 0x13b   :  { %2530 = vmatpush.bf16.msrb.mxu2 %v3922_v27  ;;  %v3890_v63 = vor.u32 %v4357_v60, %v3887_v61  ;;  %v3966_v27 = vor.u32 %v4378_v17, %v3965_v16  ;;  %v3967_v60 = vld [vmem:[#allocation4 + $0x1b8] sm:$0xf0]  ;;  %v323_v61 = vperm.slane %v4611_v40, 3 }
 0x13c   :  { %2505 = vmatpush.bf16.msrb.mxu0 %v3786_v18  ;;  %v1881_v48 = vpop.f32.mrf.mxu2  ;;  %v3882_v18 = vor.u32 %v4355_v0, %v3879_v1  ;;  %v3959_v0 = vld [vmem:[#allocation4 + $0x1a8] sm:$0xf0] }
 0x13e   :  { %2518 = vmatpush.bf16.msrb.mxu1 %v3850_v3  ;;  %v1893_v3 = vadd.f32 %v1892_v25, %v1880_v2 }
 0x13f   :  { %2531 = vmatpush.bf16.msrb.mxu2 %v3914_v41  ;;  %v1894_v50 = vpop.f32.mrf.mxu3  ;;  %v3941_v41 = vld [vmem:[#allocation4 + $0x180] sm:$0xf] }
 0x140   :  { %2506 = vmatpush.bf16.msrb.mxu0 %v3778_v10  ;;  %v3973_v10 = vld [vmem:[#allocation4 + $0x1c0] sm:$0xf]  ;;  %v3983_v50 = vld [vmem:[#allocation4 + $0x1d8] sm:$0xf0] }
 0x142   :  { %2519 = vmatpush.bf16.msrb.mxu1 %v3842_v11  ;;  %v4380_v11 = vld [vmem:[#allocation4 + $0x1c4] sm:$0xf0] }
 0x143   :  { %2532 = vmatpush.bf16.msrb.mxu2 %v3906_v49  ;;  %v4381_v49 = vld [vmem:[#allocation4 + $0x1d4] sm:$0xf] }
 0x144   :  { %2507 = vmatpush.bf16.msrb.mxu0 %v3770_v8  ;;  %v3986_v37 = vor.u32 %v4381_v49, %v3983_v50  ;;  %v4391_v49 = vld [vmem:[%s4680_s5 + $0x20] sm:$0xff]  ;;  %v4390_v50 = vld [vmem:[%s4680_s5 + $0x18] sm:$0xff] }
 0x146   :  { %2520 = vmatpush.bf16.msrb.mxu1 %v3834_v28  ;;  %v3957_v28 = vld [vmem:[#allocation4 + $0x1a0] sm:$0xf] }
 0x147   :  { %2533 = vmatpush.bf16.msrb.mxu2 %v3898_v59  ;;  %v3958_v13 = vor.u32 %v4376_v29, %v3957_v28  ;;  %v4377_v59 = vld [vmem:[#allocation4 + $0x1b4] sm:$0xf] }
 0x148   :  { %2508 = vmatpush.bf16.msrb.mxu0 %v3762_v39  ;;  %v4372_v39 = vld [vmem:[#allocation4 + $0x184] sm:$0xf0]  ;;  %v3970_v62 = vor.u32 %v4377_v59, %v3967_v60  ;;  %v4398_v59 = vld [vmem:[%s4680_s5 + $0x58] sm:$0xff]  ;;  %v4397_v60 = vld [vmem:[%s4680_s5 + $0x50] sm:$0xff] }
 0x149   :  { %v3942_v32 = vor.u32 %v4372_v39, %v3941_v41 }
 0x14a   :  { %2521 = vmatpush.bf16.msrb.mxu1 %v3826_v43  ;;  %v3999_v43 = vld [vmem:[#allocation4 + $0x1f8] sm:$0xf0] }
 0x14b   :  { %2534 = vmatpush.bf16.msrb.mxu2 %v3890_v63  ;;  %v4002_v45 = vor.u32 %v4385_v24, %v3999_v43  ;;  %v4375_v63 = vld [vmem:[#allocation4 + $0x1a4] sm:$0xf] }
 0x14c   :  { %2509 = vmatpush.bf16.msrb.mxu0 %v3754_v55  ;;  %v1905_v26 = vpop.f32.mrf.mxu0  ;;  %v3975_v55 = vld [vmem:[#allocation4 + $0x1c8] sm:$0xf0] }
 0x14d   :  { %v1906_v20 = vadd.f32 %v1905_v26, %v1893_v3  ;;  %v4373_v3 = vld [vmem:[#allocation4 + $0x194] sm:$0xf] }
 0x14e   :  { %2522 = vmatpush.bf16.msrb.mxu1 %v3818_v57  ;;  %v1918_v22 = vpop.f32.mrf.mxu1  ;;  %v3978_v57 = vor.u32 %v4379_v54, %v3975_v55  ;;  %v3954_v6 = vor.u32 %v4373_v3, %v3951_v4  ;;  %v4388_v55 = vld [vmem:[%s4680_s5 + $0x8] sm:$0xff] }
 0x14f   :  { %2510 = vmatmul.bf16.vlgmr.msrb.gmra.mxu0 %v4602_v47  ;;  %2535 = vmatpush.bf16.msrb.mxu2 %v3882_v18  ;;  %v1919_v47 = vadd.f32 %v1918_v22, %v1906_v20  ;;  %v3962_v18 = vor.u32 %v4375_v63, %v3959_v0  ;;  %v3946_v20 = vor.u32 %v4371_v7, %v3943_v19 }
 0x151   :  { %2523 = vmatmul.bf16.vlgmr.msrb.gmra.mxu1 %v4600_v46  ;;  %v3974_v46 = vor.u32 %v4380_v11, %v3973_v10 }
 0x152   :  { %2703 = vmatpush.bf16.msra.mxu1 %v4402_v44 }
 0x153   :  { %2492 = vmatpush.bf16.msra.mxu3 %v3974_v46 }
 0x154   :  { %v1931_v12 = vpop.f32.mrf.mxu2  ;;  %v1907_v23 = vpop.f32.mrf.mxu0 }
 0x155   :  { %v1932_v14 = vadd.f32 %v1931_v12, %v1919_v47 }
 0x156   :  { %v1920_v25 = vpop.f32.mrf.mxu1 }
 0x157   :  { %v1944_v15 = vpop.f32.mrf.mxu3  ;;  %2493 = vmatpush.bf16.msra.mxu3 %v3966_v27 }
 0x158   :  { %v1945_v21 = vadd.f32 %v1944_v15, %v1932_v14 }
 0x15a   :  { %v2054_v8 = vmax.f32 %v1945_v21, 0.0 }
 0x15b   :  { %2494 = vmatpush.bf16.msra.mxu3 %v3958_v13 }
 0x15c   :  { %v2058_v30 = vpack.c.bf16 %v2054_v8, %v2054_v8  ;;  %v1933_v31 = vpop.f32.mrf.mxu2  ;;  %v2124_v8 = vld [vmem:[%s4679_s4] sm:$0x3] }
 0x15d   :  { %v2126_v28 = vperm.slane %v2124_v8, 0  ;;  %v2127_v35 = vperm.slane %v2124_v8, 1 }
 0x15e   :  { %2484 = vmatmul.bf16.vlgmr.msra.gmra.mxu2 %v2058_v30 }
 0x15f   :  { %v1946_v33 = vpop.f32.mrf.mxu3  ;;  %2495 = vmatpush.bf16.msra.mxu3 %v3950_v36 }
 0x163   :  { %2496 = vmatpush.bf16.msra.mxu3 %v3942_v32 }
 0x167   :  { %2541 = vmatpush.bf16.msrb.mxu3 %v4002_v45  ;;  %v4394_v45 = vld [vmem:[%s4680_s5 + $0x38] sm:$0xff] }
 0x168   :  { %2690 = vmatpush.bf16.msra.mxu0 %v4394_v45 }
 0x16b   :  { %2542 = vmatpush.bf16.msrb.mxu3 %v3994_v42  ;;  %v4392_v42 = vld [vmem:[%s4680_s5 + $0x28] sm:$0xff] }
 0x16c   :  { %v1957_v52 = vpop.f32.mrf.mxu0  ;;  %2691 = vmatpush.bf16.msra.mxu0 %v4393_v38 }
 0x16d   :  { %v1958_v5 = vadd.f32 %v1957_v52, %v323_v61  ;;  %v4401_v52 = vld [vmem:[%s4680_s5 + $0x70] sm:$0xff]  ;;  %v4396_v61 = vld [vmem:[%s4680_s5 + $0x48] sm:$0xff] }
 0x16e   :  { %2536 = vmatmul.bf16.vlgmr.msrb.gmra.mxu2 %v2058_v30  ;;  %v1970_v48 = vpop.f32.mrf.mxu1  ;;  %2704 = vmatpush.bf16.msra.mxu1 %v4401_v52 }
 0x16f   :  { %2543 = vmatpush.bf16.msrb.mxu3 %v3986_v37  ;;  %v1971_v26 = vadd.f32 %v1970_v48, %v1958_v5 }
 0x170   :  { %2692 = vmatpush.bf16.msra.mxu0 %v4392_v42 }
 0x173   :  { %2544 = vmatpush.bf16.msrb.mxu3 %v3978_v57  ;;  %v4387_v57 = vld [vmem:[%s4680_s5] sm:$0xff] }
 0x174   :  { %v1983_v51 = vpop.f32.mrf.mxu2  ;;  %v1959_v56 = vpop.f32.mrf.mxu0  ;;  %2693 = vmatpush.bf16.msra.mxu0 %v4391_v49 }
 0x175   :  { %v1984_v22 = vadd.f32 %v1983_v51, %v1971_v26  ;;  %v4389_v51 = vld [vmem:[%s4680_s5 + $0x10] sm:$0xff]  ;;  %v4400_v56 = vld [vmem:[%s4680_s5 + $0x68] sm:$0xff] }
 0x176   :  { %v1972_v58 = vpop.f32.mrf.mxu1  ;;  %2705 = vmatpush.bf16.msra.mxu1 %v4400_v56 }
 0x177   :  { %v1996_v53 = vpop.f32.mrf.mxu3  ;;  %2545 = vmatpush.bf16.msrb.mxu3 %v3970_v62  ;;  %v4399_v58 = vld [vmem:[%s4680_s5 + $0x60] sm:$0xff] }
 0x178   :  { %v1997_v40 = vadd.f32 %v1996_v53, %v1984_v22  ;;  %2694 = vmatpush.bf16.msra.mxu0 %v4390_v50  ;;  %v4395_v62 = vld [vmem:[%s4680_s5 + $0x40] sm:$0xff] }
 0x17a   :  { %2706 = vmatpush.bf16.msra.mxu1 %v4399_v58 }
 0x17b   :  { %2546 = vmatpush.bf16.msrb.mxu3 %v3962_v18 }
 0x17c   :  { %v1985_v1 = vpop.f32.mrf.mxu2  ;;  %2695 = vmatpush.bf16.msra.mxu0 %v4389_v51 }
 0x17e   :  { %2707 = vmatpush.bf16.msra.mxu1 %v4398_v59 }
 0x17f   :  { %v1998_v2 = vpop.f32.mrf.mxu3  ;;  %2547 = vmatpush.bf16.msrb.mxu3 %v3954_v6 }
 0x180   :  { %2696 = vmatpush.bf16.msra.mxu0 %v4388_v55 }
 0x182   :  { %2708 = vmatpush.bf16.msra.mxu1 %v4397_v60 }
 0x183   :  { %2548 = vmatpush.bf16.msrb.mxu3 %v3946_v20 }
 0x184   :  { %2697 = vmatpush.bf16.msra.mxu0 %v4387_v57 }
 0x186   :  { %2709 = vmatpush.bf16.msra.mxu1 %v4396_v61 }
 0x18a   :  { %2710 = vmatpush.bf16.msra.mxu1 %v4395_v62 }
 0x18c   :  { %v2009_v9 = vpop.f32.mrf.mxu0 }
 0x18d   :  { %v2010_v10 = vadd.f32 %v2009_v9, %v1997_v40  ;;  %v4409_v40 = vld [vmem:[%s4681_s6] ss:$0 sm:$0xff] }
 0x18e   :  { %v2022_v47 = vpop.f32.mrf.mxu1 }
 0x18f   :  { %v2023_v11 = vadd.f32 %v2022_v47, %v2010_v10 }
 0x194   :  { %v2035_v12 = vpop.f32.mrf.mxu2  ;;  %v2011_v15 = vpop.f32.mrf.mxu0 }
 0x195   :  { %v2036_v46 = vadd.f32 %v2035_v12, %v2023_v11  ;;  %v2048_v14 = vpop.f32.mrf.mxu3 }
 0x196   :  { %v2024_v16 = vpop.f32.mrf.mxu1 }
 0x197   :  { %v2049_v17 = vadd.f32 %v2048_v14, %v2036_v46 }
 0x199   :  { %v2055_v21 = vmax.f32 %v2049_v17, 0.0 }
 0x19b   :  { %v2059_v23 = vpack.c.bf16 %v2055_v21, %v2055_v21 }
 0x19c   :  { %v2037_v25 = vpop.f32.mrf.mxu2 }
 0x19d   :  { %v2050_v27 = vpop.f32.mrf.mxu3  ;;  %2497 = vmatmul.bf16.vlgmr.msra.gmra.mxu3 %v2059_v23 }
 0x1ac   :  { %v2459_v29 = vpop.f32.mrf.mxu0 }
 0x1ad   :  { %v2460_v30 = vadd.f32 %v2459_v29, %v2126_v28  ;;  %2549 = vmatmul.bf16.vlgmr.msrb.gmra.mxu3 %v2059_v23 }
 0x1ae   :  { %v2472_v31 = vpop.f32.mrf.mxu1 }
 0x1af   :  { %v2473_v13 = vadd.f32 %v2472_v31, %v2460_v30 }
 0x1b4   :  { %v2461_v33 = vpop.f32.mrf.mxu0 }
 0x1b6   :  { %v2474_v34 = vpop.f32.mrf.mxu1 }
 0x1cc   :  { %v2511_v36 = vpop.f32.mrf.mxu0 }
 0x1cd   :  { %v2512_v41 = vadd.f32 %v2511_v36, %v2127_v35 }
 0x1ce   :  { %v2524_v39 = vpop.f32.mrf.mxu1 }
 0x1cf   :  { %v2525_v32 = vadd.f32 %v2524_v39, %v2512_v41 }
 0x1d4   :  { %v2513_v24 = vpop.f32.mrf.mxu0 }
 0x1d6   :  { %v2526_v43 = vpop.f32.mrf.mxu1 }
 0x1e1   :  { %v2485_v48 = vpop.f32.mrf.mxu2 }
 0x1e2   :  { %v2486_v63 = vadd.f32 %v2485_v48, %v2473_v13 }
 0x1e9   :  { %v2487_v37 = vpop.f32.mrf.mxu2 }
 0x1f1   :  { %v2537_v53 = vpop.f32.mrf.mxu2 }
 0x1f2   :  { %v2538_v4 = vadd.f32 %v2537_v53, %v2525_v32 }
 0x1f9   :  { %v2539_v54 = vpop.f32.mrf.mxu2 }
 0x220   :  { %v2498_v0 = vpop.f32.mrf.mxu3 }
 0x221   :  { %v2499_v1 = vadd.f32 %v2498_v0, %v2486_v63 }
 0x223   :  { %v2554_v2 = vmax.f32 %v2499_v1, 0.0 }
 0x225   :  { %v2556_v18 = vpack.c.bf16 %v2554_v2, %v2554_v2 }
 0x227   :  { %2698 = vmatmul.bf16.vlgmr.msra.gmra.mxu0 %v2556_v18 }
 0x228   :  { %v2500_v3 = vpop.f32.mrf.mxu3 }
 0x230   :  { %v2550_v5 = vpop.f32.mrf.mxu3 }
 0x231   :  { %v2551_v6 = vadd.f32 %v2550_v5, %v2538_v4 }
 0x233   :  { %v2555_v7 = vmax.f32 %v2551_v6, 0.0 }
 0x235   :  { %v2557_v19 = vpack.c.bf16 %v2555_v7, %v2555_v7 }
 0x237   :  { %2711 = vmatmul.bf16.vlgmr.msra.gmra.mxu1 %v2557_v19 }
 0x238   :  { %v2552_v26 = vpop.f32.mrf.mxu3 }
 0x2a4   :  { %v2699_v20 = vpop.f32.mrf.mxu0 }
 0x2a5   :  { %v2700_v9 = vadd.f32 %v4409_v40, %v2699_v20 }
 0x2ac   :  { %v2701_v22 = vpop.f32.mrf.mxu0 }
 0x2b4   :  { %v2712_v47 = vpop.f32.mrf.mxu1 }
 0x2b5   :  { %v2713_v10 = vadd.f32 %v2712_v47, %v2700_v9 }
 0x2b7   :  { %2716 = vst [vmem:[%s4682_s7] sm:$0xff] %v2713_v10 }
 0x2bc   :  { %v2714_v11 = vpop.f32.mrf.mxu1 }
 0x2bd   :  { %2721 = vsyncpa [#allocation3], 1 }
 0x2be   :  { %2722 = vsyncpa [#allocation5], 1 }

</bundles_post_ra>
